<compile_context>
chip_gen: v7x
topology: tpu7x:2x2x1
jax: 0.10.0
libtpu: 0.0.40
codegen_flags: <defaults>
</compile_context>

<pallas_src>
import functools

import jax
import jax.numpy as jnp
import numpy as np
from jax.experimental import pallas as pl
from jax.experimental.pallas import tpu as pltpu


# ----------------------------------------------------------------------------
# Fused forward kernel: perception convs + img/pose MLPs + CVAE enc/reparam/dec
# ----------------------------------------------------------------------------
def _mtg_fused_kernel(
    # data
    xrows_ref,        # (3, Y1*BP, W+2)  conv1 row slabs: row = oy*BP + b
    misc_ref,         # (BP, path+latent+pose) packed [path | eps | last_poses]
    # perception weights (convs lowered to compact per-kernel-row matmuls)
    w1r_ref, b1r_ref,      # (3, W+2, N1), (1, N1)    N1 = (X1+2)*C1 (x-padded)
    w2r_ref, b2r_ref,      # (3, N1, N2), (1, N2)     N2 = X2*C2
    wimg_ref, bimg_ref,    # (Y2, N2, F_img), (1, F_img)   img_fc split per conv2 row
    wpose_ref, bpose_ref,
    # CVAE encoder (enc_fc1 split over [img | pose | path]; mu|logvar fused on N)
    wei_ref, wep_ref, wet_ref, be_ref,
    wmulv_ref, bmulv_ref,
    # CVAE decoder (dec_fc1 split over [z | img | pose])
    wdz_ref, wdi_ref, wdp_ref, bd_ref,
    wo_ref, bo_ref,
    # output
    out_ref,          # (BP, 2*latent + path_dim) packed [mu | logvar | waypoints]
    # scratch
    h1pad_ref,        # ((Y1+2)*BP, N1) f32: y-padded conv1 activation, row=y_pad*BP+b
    *, latent, path_dim, pose_dim,
):
    f32 = jnp.float32
    bf16 = jnp.bfloat16
    BP = misc_ref.shape[0]
    KY = xrows_ref.shape[0]            # 3 kernel rows
    Y1 = xrows_ref.shape[1] // BP      # conv1 output rows (8)
    Y2 = wimg_ref.shape[0]             # conv2 output rows (4)
    N1 = h1pad_ref.shape[1]

    def mm(x, w):  # bf16 x bf16 MXU matmul with f32 accumulation
        return jnp.dot(x.astype(bf16), w, preferred_element_type=f32)

    # --- conv1: 3 row matmuls; x-padding folded into zero weight/bias columns ----
    h1 = b1r_ref[...]
    for ky in range(KY):
        h1 = h1 + mm(xrows_ref[ky], w1r_ref[ky])
    h1 = jnp.maximum(h1, 0.0)                          # (Y1*BP, N1), pad lanes stay 0

    # --- y-pad the conv1 activation into the VMEM scratch -------------------------
    zrow = jnp.zeros((BP, N1), f32)
    h1pad_ref[pl.ds(0, BP), :] = zrow                  # top zero-pad row block
    h1pad_ref[pl.ds((Y1 + 1) * BP, BP), :] = zrow      # bottom zero-pad row block
    h1pad_ref[pl.ds(BP, Y1 * BP), :] = h1              # interior rows (one store)

    # --- conv2 rows + img_fc folded per output row --------------------------------
    img_acc = jnp.zeros((BP, bimg_ref.shape[1]), f32)
    for oy2 in range(Y2):
        acc = b2r_ref[...]
        for ky2 in range(KY):
            rows = h1pad_ref[pl.ds((2 * oy2 + ky2) * BP, BP), :]   # (BP, N1)
            acc = acc + mm(rows, w2r_ref[ky2])
        h2r = jnp.maximum(acc, 0.0)                    # conv2 output row (BP, N2)
        img_acc = img_acc + mm(h2r, wimg_ref[oy2])
    img = jnp.maximum(img_acc + bimg_ref[...], 0.0)    # (BP, F_img)

    # --- pose MLP + CVAE encoder (concat @ W == split-weight sums) ----------------
    misc = misc_ref[...]
    path_in = misc[:, 0:path_dim]
    eps = misc[:, path_dim:path_dim + latent]
    pose_in = misc[:, path_dim + latent:path_dim + latent + pose_dim]

    pose = jnp.maximum(mm(pose_in, wpose_ref[...]) + bpose_ref[...], 0.0)
    eh = (mm(img, wei_ref[...]) + mm(pose, wep_ref[...])
          + mm(path_in, wet_ref[...]) + be_ref[...])
    eh = jnp.maximum(eh, 0.0)

    mulv = mm(eh, wmulv_ref[...]) + bmulv_ref[...]     # (BP, 2*latent) = [mu|logvar]
    mu = mulv[:, :latent]
    logvar = mulv[:, latent:2 * latent]

    # --- reparameterization (exp -> EUP) + decoder ---------------------------------
    z = mu + jnp.exp(0.5 * logvar) * eps
    dh = (mm(z, wdz_ref[...]) + mm(img, wdi_ref[...])
          + mm(pose, wdp_ref[...]) + bd_ref[...])
    dh = jnp.maximum(dh, 0.0)
    wp = mm(dh, wo_ref[...]) + bo_ref[...]             # (BP, path_dim)

    # --- single packed output slab --------------------------------------------------
    out_ref[:, 0:2 * latent] = mulv
    out_ref[:, 2 * latent:2 * latent + path_dim] = wp


def mtg_forward(fused, meta, input_dict, eps):
    """Single-pallas_call MTG forward (ModelType.cvae branch)."""
    png = input_dict["png"]                 # (B, 1, H, W)
    last_poses = input_dict["last_poses"]   # (B, 3)
    path = input_dict["path"]               # (B, T, 2)
    B, C, H, _ = png.shape
    assert C == 1, "conv1 row lowering assumes a single-channel occupancy png"
    latent = meta["latent"]
    path_dim = meta["waypoints"] * 2
    pose_dim = last_poses.shape[1]

    BP = max(8, ((B + 7) // 8) * 8)         # pad batch to the f32 sublane multiple

    def pad_batch(a):
        if BP == B:
            return a
        return jnp.pad(a, [(0, BP - B)] + [(0, 0)] * (a.ndim - 1))

    # conv1 row slabs: padded image rows 2*oy+ky for ky=0..2, y-major rows (oy*BP+b).
    Y1 = H // 2
    imgp = jnp.pad(pad_batch(png[:, 0]), ((0, 0), (1, 1), (1, 1)))  # (BP, H+2, W+2)
    xrows = jnp.stack(
        [imgp[:, ky:ky + 2 * Y1:2, :].transpose(1, 0, 2).reshape(Y1 * BP, -1)
         for ky in range(3)], axis=0)                               # (3, Y1*BP, W+2)

    # Packed tiny inputs -> one lane-denser slab: [path | eps | last_poses].
    misc = jnp.concatenate(
        [pad_batch(path.reshape(B, -1)), pad_batch(eps), pad_batch(last_poses)],
        axis=1)

    args = (
        xrows, misc,
        fused["w1r"], fused["b1r"], fused["w2r"], fused["b2r"],
        fused["wimg"], fused["bimg"], fused["wpose"], fused["bpose"],
        fused["wei"], fused["wep"], fused["wet"], fused["be"],
        fused["wmulv"], fused["bmulv"],
        fused["wdz"], fused["wdi"], fused["wdp"], fused["bd"],
        fused["wo"], fused["bo"],
    )

    N1 = fused["w1r"].shape[2]
    Y2 = fused["wimg"].shape[0]
    out_w = 2 * latent + path_dim
    vmem = pl.BlockSpec(memory_space=pltpu.MemorySpace.VMEM)

    flops = 2 * (
        3 * xrows.shape[1] * xrows.shape[2] * N1
        + Y2 * 3 * BP * N1 * fused["w2r"].shape[2]
        + Y2 * BP * fused["wimg"].shape[1] * fused["wimg"].shape[2]
        + BP * (fused["wpose"].shape[0] * fused["wpose"].shape[1]
                + (fused["wei"].shape[0] + fused["wep"].shape[0]
                   + fused["wet"].shape[0]) * fused["be"].shape[1]
                + fused["wmulv"].shape[0] * fused["wmulv"].shape[1]
                + (fused["wdz"].shape[0] + fused["wdi"].shape[0]
                   + fused["wdp"].shape[0]) * fused["bd"].shape[1]
                + fused["wo"].shape[0] * fused["wo"].shape[1]))
    bytes_accessed = int(sum(a.size * a.dtype.itemsize for a in args) + BP * out_w * 4)

    packed = pl.pallas_call(
        functools.partial(_mtg_fused_kernel, latent=latent,
                          path_dim=path_dim, pose_dim=pose_dim),
        out_shape=jax.ShapeDtypeStruct((BP, out_w), jnp.float32),
        in_specs=[vmem] * len(args),
        out_specs=vmem,
        scratch_shapes=[pltpu.VMEM(((Y1 + 2) * BP, N1), jnp.float32)],
        cost_estimate=pl.CostEstimate(flops=flops, transcendentals=BP * latent,
                                      bytes_accessed=bytes_accessed),
    )(*args)

    mu = packed[:B, :latent]
    logvar = packed[:B, latent:2 * latent]
    wp = packed[:B, 2 * latent:].reshape(B, meta["waypoints"], 2)

    # Output dict mirrors MTG.forward for the cvae model type.
    return {"path": path, "png": png, "last_poses": last_poses,
            "mu": mu, "logvar": logvar, "y_hat": wp}


# ----------------------------------------------------------------------------
# Parameter initialization (deterministic, synthetic) — raw PyTorch-style params
# ----------------------------------------------------------------------------
def _dense_init(key, fan_in, fan_out):
    kw, kb = jax.random.split(key)
    s = 1.0 / jnp.sqrt(fan_in)
    w = jax.random.uniform(kw, (fan_in, fan_out), jnp.float32, -s, s)
    b = jax.random.uniform(kb, (fan_out,), jnp.float32, -s, s)
    return w, b


def _conv_init(key, cout, cin, kh, kw_):
    kw, kb = jax.random.split(key)
    s = 1.0 / jnp.sqrt(cin * kh * kw_)
    w = jax.random.uniform(kw, (cout, cin, kh, kw_), jnp.float32, -s, s)
    b = jax.random.uniform(kb, (cout,), jnp.float32, -s, s)
    return w, b


def init_mtg_params(key, *, img_ch=1, img_hw=16, pose_dim=3, waypoints=8,
                    img_feat=32, pose_feat=16, hidden=64, latent=16):
    keys = jax.random.split(key, 10)
    params = {}
    params["conv1"] = _conv_init(keys[0], 8, img_ch, 3, 3)       # 16x16 -> 8x8
    params["conv2"] = _conv_init(keys[1], 16, 8, 3, 3)           # 8x8  -> 4x4
    flat = 16 * (img_hw // 4) * (img_hw // 4)                    # 256
    params["img_fc"] = _dense_init(keys[2], flat, img_feat)
    params["pose_fc"] = _dense_init(keys[3], pose_dim, pose_feat)
    obs_dim = img_feat + pose_feat
    path_flat = waypoints * 2
    params["enc_fc1"] = _dense_init(keys[4], obs_dim + path_flat, hidden)
    params["enc_mu"] = _dense_init(keys[5], hidden, latent)
    params["enc_logvar"] = _dense_init(keys[6], hidden, latent)
    params["dec_fc1"] = _dense_init(keys[7], latent + obs_dim, hidden)
    params["dec_fc2"] = _dense_init(keys[8], hidden, path_flat)
    meta = dict(waypoints=waypoints, latent=latent, obs_dim=obs_dim,
                img_feat=img_feat, pose_feat=pose_feat, img_hw=img_hw)
    return params, meta


# ----------------------------------------------------------------------------
# One-time prep: compact per-row conv weights, split concat-weights, bf16 cast
# ----------------------------------------------------------------------------
def _conv1_row_weights(w1, x_out):
    """(3, 2*x_out+2, (x_out+2)*cout) block-banded row weights for a stride-2 3x3
    single-channel conv with pad=1.  Columns for the output x-pad positions are zero,
    so the result is already x-padded for conv2."""
    cout = w1.shape[0]
    W = np.zeros((3, 2 * x_out + 2, (x_out + 2) * cout), np.float32)
    for ky in range(3):
        for ox in range(x_out):
            for kx in range(3):
                W[ky, 2 * ox + kx, (ox + 1) * cout:(ox + 2) * cout] += w1[:, 0, ky, kx]
    return W


def _conv2_row_weights(w2, x_out):
    """(3, (2*x_out+2)*cin, x_out*cout) block-banded row weights for a stride-2 3x3
    conv with pad=1 whose input rows are already x-padded (lane = x_pad*cin + ci)."""
    cout, cin = w2.shape[0], w2.shape[1]
    W = np.zeros((3, (2 * x_out + 2) * cin, x_out * cout), np.float32)
    for ky in range(3):
        for ox in range(x_out):
            for kx in range(3):
                xin = 2 * ox + kx
                W[ky, xin * cin:(xin + 1) * cin,
                  ox * cout:(ox + 1) * cout] += w2[:, :, ky, kx].T
    return W


def prepare_fused_params(raw, meta):
    """One-time prep (outside the traced forward)."""
    f32 = np.float32
    w1, b1 = [np.asarray(a, f32) for a in raw["conv1"]]
    w2, b2 = [np.asarray(a, f32) for a in raw["conv2"]]
    assert w1.shape[1] == 1, "conv1 row lowering assumes a single input channel"
    hw = meta["img_hw"]
    x1, x2 = hw // 2, hw // 4                  # conv1 / conv2 output width (8, 4)
    cout1, cout2 = w1.shape[0], w2.shape[0]

    w1r = _conv1_row_weights(w1, x1)           # (3, 18, 80)
    w2r = _conv2_row_weights(w2, x2)           # (3, 80, 64)
    b1r = np.zeros(((x1 + 2) * cout1,), f32)
    b1r[cout1:(x1 + 1) * cout1] = np.tile(b1, x1)   # zero bias on x-pad lanes
    b2r = np.tile(b2, x2)

    # img_fc rows follow the (y, x, c) flatten of the conv2 output; split per y row.
    # NOTE: reinterpretation of torch's NCHW flatten (synthetic weights); loading a
    # real PyTorch checkpoint would require permuting these rows.
    wimg = np.asarray(raw["img_fc"][0], f32).reshape(x2, x2 * cout2, meta["img_feat"])

    n_img, n_pose, lat = meta["img_feat"], meta["pose_feat"], meta["latent"]
    we1, be1 = raw["enc_fc1"]      # rows ordered [img | pose | path]
    wd1, bd1 = raw["dec_fc1"]      # rows ordered [z | img | pose]
    w_mulv = np.concatenate([np.asarray(raw["enc_mu"][0], f32),
                             np.asarray(raw["enc_logvar"][0], f32)], axis=1)
    b_mulv = np.concatenate([np.asarray(raw["enc_mu"][1], f32),
                             np.asarray(raw["enc_logvar"][1], f32)], axis=0)

    Wb = lambda a: jnp.asarray(a, jnp.bfloat16)                  # weights -> bf16
    Bf = lambda a: jnp.asarray(a, jnp.float32).reshape(1, -1)    # biases -> (1,N) f32
    return {
        "w1r": Wb(w1r), "b1r": Bf(b1r),
        "w2r": Wb(w2r), "b2r": Bf(b2r),
        "wimg": Wb(wimg), "bimg": Bf(raw["img_fc"][1]),
        "wpose": Wb(raw["pose_fc"][0]), "bpose": Bf(raw["pose_fc"][1]),
        "wei": Wb(we1[:n_img]), "wep": Wb(we1[n_img:n_img + n_pose]),
        "wet": Wb(we1[n_img + n_pose:]), "be": Bf(be1),
        "wmulv": Wb(w_mulv), "bmulv": Bf(b_mulv),
        "wdz": Wb(wd1[:lat]), "wdi": Wb(wd1[lat:lat + n_img]),
        "wdp": Wb(wd1[lat + n_img:]), "bd": Bf(bd1),
        "wo": Wb(raw["dec_fc2"][0]), "bo": Bf(raw["dec_fc2"][1]),
    }


# ----------------------------------------------------------------------------
# Plain-JAX reference (lax.conv + concats) — validates the fused kernel
# ----------------------------------------------------------------------------
def mtg_reference(raw, meta, input_dict, eps):
    png, pose, path = input_dict["png"], input_dict["last_poses"], input_dict["path"]
    B = png.shape[0]

    def conv(x, w, b, stride, pad):
        y = jax.lax.conv_general_dilated(
            x, w, (stride, stride), [(pad, pad), (pad, pad)],
            dimension_numbers=("NCHW", "OIHW", "NCHW"))
        return jax.nn.relu(y + b[None, :, None, None])

    h = conv(png, *raw["conv1"], 2, 1)
    h = conv(h, *raw["conv2"], 2, 1)
    h = h.transpose(0, 2, 3, 1).reshape(B, -1)          # (y, x, c) flat, as in kernel
    img = jax.nn.relu(h @ raw["img_fc"][0] + raw["img_fc"][1])
    pf = jax.nn.relu(pose @ raw["pose_fc"][0] + raw["pose_fc"][1])
    obs = jnp.concatenate([img, pf], axis=-1)
    enc_in = jnp.concatenate([obs, path.reshape(B, -1)], axis=-1)
    eh = jax.nn.relu(enc_in @ raw["enc_fc1"][0] + raw["enc_fc1"][1])
    mu = eh @ raw["enc_mu"][0] + raw["enc_mu"][1]
    logvar = eh @ raw["enc_logvar"][0] + raw["enc_logvar"][1]
    z = mu + jnp.exp(0.5 * logvar) * eps
    dec_in = jnp.concatenate([z, obs], axis=-1)
    dh = jax.nn.relu(dec_in @ raw["dec_fc1"][0] + raw["dec_fc1"][1])
    wp = dh @ raw["dec_fc2"][0] + raw["dec_fc2"][1]
    return mu, logvar, wp.reshape(B, meta["waypoints"], 2)


# ----------------------------------------------------------------------------
if __name__ == "__main__":
    key = jax.random.PRNGKey(0)
    k_params, k_png, k_pose, k_path, k_eps = jax.random.split(key, 5)

    B, C, H, W = 2, 1, 16, 16
    T = 8  # waypoints per path

    raw_params, meta = init_mtg_params(k_params, img_ch=C, img_hw=H, waypoints=T)
    fused_params = prepare_fused_params(raw_params, meta)   # one-time, outside jit

    input_dict = {
        "png": jax.random.uniform(k_png, (B, C, H, W), jnp.float32),
        "last_poses": jax.random.normal(k_pose, (B, 3), jnp.float32),
        "path": jax.random.normal(k_path, (B, T, 2), jnp.float32),
    }
    # eps for the reparameterization trick (passed in so the run is deterministic).
    eps = jax.random.normal(k_eps, (B, meta["latent"]), jnp.float32)

    fwd = jax.jit(functools.partial(mtg_forward, fused_params, meta))
    out = jax.block_until_ready(fwd(input_dict, eps))

    assert out["y_hat"].shape == (B, T, 2)
    assert out["mu"].shape == (B, meta["latent"])
    assert out["logvar"].shape == (B, meta["latent"])

    # Validate the fused kernel (incl. the compact conv lowering + bf16 weights)
    # against plain JAX f32.  Tolerance covers MXU bf16-operand rounding.
    mu_r, lv_r, wp_r = mtg_reference(raw_params, meta, input_dict, eps)
    for got, ref in ((out["mu"], mu_r), (out["logvar"], lv_r), (out["y_hat"], wp_r)):
        err = float(jnp.max(jnp.abs(got - ref)))
        assert jnp.allclose(got, ref, rtol=3e-2, atol=3e-2), f"max abs err {err}"

    print("KERNEL_OK")
</pallas_src>

<mosaic_0001>
module attributes {stable_mosaic.version = 11 : i64} {
  func.func @_mtg_fused_kernel(%arg0: memref<3x64x18xf32, #tpu.memory_space<vmem>>, %arg1: memref<8x35xf32, #tpu.memory_space<vmem>>, %arg2: memref<3x18x80xbf16, #tpu.memory_space<vmem>>, %arg3: memref<1x80xf32, #tpu.memory_space<vmem>>, %arg4: memref<3x80x64xbf16, #tpu.memory_space<vmem>>, %arg5: memref<1x64xf32, #tpu.memory_space<vmem>>, %arg6: memref<4x64x32xbf16, #tpu.memory_space<vmem>>, %arg7: memref<1x32xf32, #tpu.memory_space<vmem>>, %arg8: memref<3x16xbf16, #tpu.memory_space<vmem>>, %arg9: memref<1x16xf32, #tpu.memory_space<vmem>>, %arg10: memref<32x64xbf16, #tpu.memory_space<vmem>>, %arg11: memref<16x64xbf16, #tpu.memory_space<vmem>>, %arg12: memref<16x64xbf16, #tpu.memory_space<vmem>>, %arg13: memref<1x64xf32, #tpu.memory_space<vmem>>, %arg14: memref<64x32xbf16, #tpu.memory_space<vmem>>, %arg15: memref<1x32xf32, #tpu.memory_space<vmem>>, %arg16: memref<16x64xbf16, #tpu.memory_space<vmem>>, %arg17: memref<32x64xbf16, #tpu.memory_space<vmem>>, %arg18: memref<16x64xbf16, #tpu.memory_space<vmem>>, %arg19: memref<1x64xf32, #tpu.memory_space<vmem>>, %arg20: memref<64x16xbf16, #tpu.memory_space<vmem>>, %arg21: memref<1x16xf32, #tpu.memory_space<vmem>>, %arg22: memref<8x48xf32, #tpu.memory_space<vmem>>, %arg23: memref<80x80xf32, #tpu.memory_space<vmem>>) attributes {dimension_semantics = [], scalar_prefetch = 0 : i64, scratch_operands = 1 : i64, tpu.core_type = #tpu.core_type<tc>} {
    %c0 = arith.constant 0 : index
    %c0_0 = arith.constant 0 : index
    %0 = vector.load %arg3[%c0, %c0_0] : memref<1x80xf32, #tpu.memory_space<vmem>>, vector<1x80xf32>
    %c0_1 = arith.constant 0 : index
    %c0_2 = arith.constant 0 : index
    %c0_3 = arith.constant 0 : index
    %1 = vector.load %arg0[%c0_1, %c0_2, %c0_3] : memref<3x64x18xf32, #tpu.memory_space<vmem>>, vector<1x64x18xf32>
    %2 = vector.shape_cast %1 : vector<1x64x18xf32> to vector<64x18xf32>
    %c0_4 = arith.constant 0 : index
    %c0_5 = arith.constant 0 : index
    %c0_6 = arith.constant 0 : index
    %3 = vector.load %arg2[%c0_4, %c0_5, %c0_6] : memref<3x18x80xbf16, #tpu.memory_space<vmem>>, vector<1x18x80xbf16>
    %4 = vector.shape_cast %3 : vector<1x18x80xbf16> to vector<18x80xbf16>
    %5 = arith.truncf %2 : vector<64x18xf32> to vector<64x18xbf16>
    %cst = arith.constant dense<0.000000e+00> : vector<64x80xf32>
    %6 = tpu.matmul %5, %4, %cst {dimension_numbers = #tpu.dot_dimension_numbers<[1], [0], [0], [1], [0, 0, 1, 1], [], []>} : vector<64x18xbf16>, vector<18x80xbf16>, vector<64x80xf32> -> vector<64x80xf32>
    %7 = vector.broadcast %0 : vector<1x80xf32> to vector<64x80xf32>
    %8 = arith.addf %7, %6 : vector<64x80xf32>
    %c1 = arith.constant 1 : index
    %c0_7 = arith.constant 0 : index
    %c0_8 = arith.constant 0 : index
    %9 = vector.load %arg0[%c1, %c0_7, %c0_8] : memref<3x64x18xf32, #tpu.memory_space<vmem>>, vector<1x64x18xf32>
    %10 = vector.shape_cast %9 : vector<1x64x18xf32> to vector<64x18xf32>
    %c1_9 = arith.constant 1 : index
    %c0_10 = arith.constant 0 : index
    %c0_11 = arith.constant 0 : index
    %11 = vector.load %arg2[%c1_9, %c0_10, %c0_11] : memref<3x18x80xbf16, #tpu.memory_space<vmem>>, vector<1x18x80xbf16>
    %12 = vector.shape_cast %11 : vector<1x18x80xbf16> to vector<18x80xbf16>
    %13 = arith.truncf %10 : vector<64x18xf32> to vector<64x18xbf16>
    %cst_12 = arith.constant dense<0.000000e+00> : vector<64x80xf32>
    %14 = tpu.matmul %13, %12, %cst_12 {dimension_numbers = #tpu.dot_dimension_numbers<[1], [0], [0], [1], [0, 0, 1, 1], [], []>} : vector<64x18xbf16>, vector<18x80xbf16>, vector<64x80xf32> -> vector<64x80xf32>
    %15 = arith.addf %8, %14 : vector<64x80xf32>
    %c2 = arith.constant 2 : index
    %c0_13 = arith.constant 0 : index
    %c0_14 = arith.constant 0 : index
    %16 = vector.load %arg0[%c2, %c0_13, %c0_14] : memref<3x64x18xf32, #tpu.memory_space<vmem>>, vector<1x64x18xf32>
    %17 = vector.shape_cast %16 : vector<1x64x18xf32> to vector<64x18xf32>
    %c2_15 = arith.constant 2 : index
    %c0_16 = arith.constant 0 : index
    %c0_17 = arith.constant 0 : index
    %18 = vector.load %arg2[%c2_15, %c0_16, %c0_17] : memref<3x18x80xbf16, #tpu.memory_space<vmem>>, vector<1x18x80xbf16>
    %19 = vector.shape_cast %18 : vector<1x18x80xbf16> to vector<18x80xbf16>
    %20 = arith.truncf %17 : vector<64x18xf32> to vector<64x18xbf16>
    %cst_18 = arith.constant dense<0.000000e+00> : vector<64x80xf32>
    %21 = tpu.matmul %20, %19, %cst_18 {dimension_numbers = #tpu.dot_dimension_numbers<[1], [0], [0], [1], [0, 0, 1, 1], [], []>} : vector<64x18xbf16>, vector<18x80xbf16>, vector<64x80xf32> -> vector<64x80xf32>
    %22 = arith.addf %15, %21 : vector<64x80xf32>
    %cst_19 = arith.constant 0.000000e+00 : f32
    %23 = vector.broadcast %cst_19 : f32 to vector<64x80xf32>
    %24 = arith.maximumf %22, %23 : vector<64x80xf32>
    %cst_20 = arith.constant 0.000000e+00 : f32
    %25 = vector.broadcast %cst_20 : f32 to vector<8x80xf32>
    %c0_21 = arith.constant 0 : index
    %c0_22 = arith.constant 0 : index
    %26 = vector.load %arg23[%c0_21, %c0_22] : memref<80x80xf32, #tpu.memory_space<vmem>>, vector<8x80xf32>
    tpu.vector_store %arg23[%c0_21, %c0_22], %25 {strides = array<i32>} : memref<80x80xf32, #tpu.memory_space<vmem>>, vector<8x80xf32>,
    %c72 = arith.constant 72 : index
    %c0_23 = arith.constant 0 : index
    %27 = vector.load %arg23[%c72, %c0_23] : memref<80x80xf32, #tpu.memory_space<vmem>>, vector<8x80xf32>
    tpu.vector_store %arg23[%c72, %c0_23], %25 {strides = array<i32>} : memref<80x80xf32, #tpu.memory_space<vmem>>, vector<8x80xf32>,
    %c8 = arith.constant 8 : index
    %c0_24 = arith.constant 0 : index
    %28 = vector.load %arg23[%c8, %c0_24] : memref<80x80xf32, #tpu.memory_space<vmem>>, vector<64x80xf32>
    tpu.vector_store %arg23[%c8, %c0_24], %24 {strides = array<i32>} : memref<80x80xf32, #tpu.memory_space<vmem>>, vector<64x80xf32>,
    %cst_25 = arith.constant 0.000000e+00 : f32
    %29 = vector.broadcast %cst_25 : f32 to vector<8x32xf32>
    %c0_26 = arith.constant 0 : index
    %c0_27 = arith.constant 0 : index
    %30 = vector.load %arg5[%c0_26, %c0_27] : memref<1x64xf32, #tpu.memory_space<vmem>>, vector<1x64xf32>
    %c0_28 = arith.constant 0 : index
    %c0_29 = arith.constant 0 : index
    %31 = vector.load %arg23[%c0_28, %c0_29] : memref<80x80xf32, #tpu.memory_space<vmem>>, vector<8x80xf32>
    %c0_30 = arith.constant 0 : index
    %c0_31 = arith.constant 0 : index
    %c0_32 = arith.constant 0 : index
    %32 = vector.load %arg4[%c0_30, %c0_31, %c0_32] : memref<3x80x64xbf16, #tpu.memory_space<vmem>>, vector<1x80x64xbf16>
    %33 = vector.shape_cast %32 : vector<1x80x64xbf16> to vector<80x64xbf16>
    %34 = arith.truncf %31 : vector<8x80xf32> to vector<8x80xbf16>
    %cst_33 = arith.constant dense<0.000000e+00> : vector<8x64xf32>
    %35 = tpu.matmul %34, %33, %cst_33 {dimension_numbers = #tpu.dot_dimension_numbers<[1], [0], [0], [1], [0, 0, 1, 1], [], []>} : vector<8x80xbf16>, vector<80x64xbf16>, vector<8x64xf32> -> vector<8x64xf32>
    %36 = vector.broadcast %30 : vector<1x64xf32> to vector<8x64xf32>
    %37 = arith.addf %36, %35 : vector<8x64xf32>
    %c8_34 = arith.constant 8 : index
    %c0_35 = arith.constant 0 : index
    %38 = vector.load %arg23[%c8_34, %c0_35] : memref<80x80xf32, #tpu.memory_space<vmem>>, vector<8x80xf32>
    %c1_36 = arith.constant 1 : index
    %c0_37 = arith.constant 0 : index
    %c0_38 = arith.constant 0 : index
    %39 = vector.load %arg4[%c1_36, %c0_37, %c0_38] : memref<3x80x64xbf16, #tpu.memory_space<vmem>>, vector<1x80x64xbf16>
    %40 = vector.shape_cast %39 : vector<1x80x64xbf16> to vector<80x64xbf16>
    %41 = arith.truncf %38 : vector<8x80xf32> to vector<8x80xbf16>
    %cst_39 = arith.constant dense<0.000000e+00> : vector<8x64xf32>
    %42 = tpu.matmul %41, %40, %cst_39 {dimension_numbers = #tpu.dot_dimension_numbers<[1], [0], [0], [1], [0, 0, 1, 1], [], []>} : vector<8x80xbf16>, vector<80x64xbf16>, vector<8x64xf32> -> vector<8x64xf32>
    %43 = arith.addf %37, %42 : vector<8x64xf32>
    %c16 = arith.constant 16 : index
    %c0_40 = arith.constant 0 : index
    %44 = vector.load %arg23[%c16, %c0_40] : memref<80x80xf32, #tpu.memory_space<vmem>>, vector<8x80xf32>
    %c2_41 = arith.constant 2 : index
    %c0_42 = arith.constant 0 : index
    %c0_43 = arith.constant 0 : index
    %45 = vector.load %arg4[%c2_41, %c0_42, %c0_43] : memref<3x80x64xbf16, #tpu.memory_space<vmem>>, vector<1x80x64xbf16>
    %46 = vector.shape_cast %45 : vector<1x80x64xbf16> to vector<80x64xbf16>
    %47 = arith.truncf %44 : vector<8x80xf32> to vector<8x80xbf16>
    %cst_44 = arith.constant dense<0.000000e+00> : vector<8x64xf32>
    %48 = tpu.matmul %47, %46, %cst_44 {dimension_numbers = #tpu.dot_dimension_numbers<[1], [0], [0], [1], [0, 0, 1, 1], [], []>} : vector<8x80xbf16>, vector<80x64xbf16>, vector<8x64xf32> -> vector<8x64xf32>
    %49 = arith.addf %43, %48 : vector<8x64xf32>
    %cst_45 = arith.constant 0.000000e+00 : f32
    %50 = vector.broadcast %cst_45 : f32 to vector<8x64xf32>
    %51 = arith.maximumf %49, %50 : vector<8x64xf32>
    %c0_46 = arith.constant 0 : index
    %c0_47 = arith.constant 0 : index
    %c0_48 = arith.constant 0 : index
    %52 = vector.load %arg6[%c0_46, %c0_47, %c0_48] : memref<4x64x32xbf16, #tpu.memory_space<vmem>>, vector<1x64x32xbf16>
    %53 = vector.shape_cast %52 : vector<1x64x32xbf16> to vector<64x32xbf16>
    %54 = arith.truncf %51 : vector<8x64xf32> to vector<8x64xbf16>
    %cst_49 = arith.constant dense<0.000000e+00> : vector<8x32xf32>
    %55 = tpu.matmul %54, %53, %cst_49 {dimension_numbers = #tpu.dot_dimension_numbers<[1], [0], [0], [1], [0, 0, 1, 1], [], []>} : vector<8x64xbf16>, vector<64x32xbf16>, vector<8x32xf32> -> vector<8x32xf32>
    %56 = arith.addf %29, %55 : vector<8x32xf32>
    %c0_50 = arith.constant 0 : index
    %c0_51 = arith.constant 0 : index
    %57 = vector.load %arg5[%c0_50, %c0_51] : memref<1x64xf32, #tpu.memory_space<vmem>>, vector<1x64xf32>
    %c16_52 = arith.constant 16 : index
    %c0_53 = arith.constant 0 : index
    %58 = vector.load %arg23[%c16_52, %c0_53] : memref<80x80xf32, #tpu.memory_space<vmem>>, vector<8x80xf32>
    %c0_54 = arith.constant 0 : index
    %c0_55 = arith.constant 0 : index
    %c0_56 = arith.constant 0 : index
    %59 = vector.load %arg4[%c0_54, %c0_55, %c0_56] : memref<3x80x64xbf16, #tpu.memory_space<vmem>>, vector<1x80x64xbf16>
    %60 = vector.shape_cast %59 : vector<1x80x64xbf16> to vector<80x64xbf16>
    %61 = arith.truncf %58 : vector<8x80xf32> to vector<8x80xbf16>
    %cst_57 = arith.constant dense<0.000000e+00> : vector<8x64xf32>
    %62 = tpu.matmul %61, %60, %cst_57 {dimension_numbers = #tpu.dot_dimension_numbers<[1], [0], [0], [1], [0, 0, 1, 1], [], []>} : vector<8x80xbf16>, vector<80x64xbf16>, vector<8x64xf32> -> vector<8x64xf32>
    %63 = vector.broadcast %57 : vector<1x64xf32> to vector<8x64xf32>
    %64 = arith.addf %63, %62 : vector<8x64xf32>
    %c24 = arith.constant 24 : index
    %c0_58 = arith.constant 0 : index
    %65 = vector.load %arg23[%c24, %c0_58] : memref<80x80xf32, #tpu.memory_space<vmem>>, vector<8x80xf32>
    %c1_59 = arith.constant 1 : index
    %c0_60 = arith.constant 0 : index
    %c0_61 = arith.constant 0 : index
    %66 = vector.load %arg4[%c1_59, %c0_60, %c0_61] : memref<3x80x64xbf16, #tpu.memory_space<vmem>>, vector<1x80x64xbf16>
    %67 = vector.shape_cast %66 : vector<1x80x64xbf16> to vector<80x64xbf16>
    %68 = arith.truncf %65 : vector<8x80xf32> to vector<8x80xbf16>
    %cst_62 = arith.constant dense<0.000000e+00> : vector<8x64xf32>
    %69 = tpu.matmul %68, %67, %cst_62 {dimension_numbers = #tpu.dot_dimension_numbers<[1], [0], [0], [1], [0, 0, 1, 1], [], []>} : vector<8x80xbf16>, vector<80x64xbf16>, vector<8x64xf32> -> vector<8x64xf32>
    %70 = arith.addf %64, %69 : vector<8x64xf32>
    %c32 = arith.constant 32 : index
    %c0_63 = arith.constant 0 : index
    %71 = vector.load %arg23[%c32, %c0_63] : memref<80x80xf32, #tpu.memory_space<vmem>>, vector<8x80xf32>
    %c2_64 = arith.constant 2 : index
    %c0_65 = arith.constant 0 : index
    %c0_66 = arith.constant 0 : index
    %72 = vector.load %arg4[%c2_64, %c0_65, %c0_66] : memref<3x80x64xbf16, #tpu.memory_space<vmem>>, vector<1x80x64xbf16>
    %73 = vector.shape_cast %72 : vector<1x80x64xbf16> to vector<80x64xbf16>
    %74 = arith.truncf %71 : vector<8x80xf32> to vector<8x80xbf16>
    %cst_67 = arith.constant dense<0.000000e+00> : vector<8x64xf32>
    %75 = tpu.matmul %74, %73, %cst_67 {dimension_numbers = #tpu.dot_dimension_numbers<[1], [0], [0], [1], [0, 0, 1, 1], [], []>} : vector<8x80xbf16>, vector<80x64xbf16>, vector<8x64xf32> -> vector<8x64xf32>
    %76 = arith.addf %70, %75 : vector<8x64xf32>
    %cst_68 = arith.constant 0.000000e+00 : f32
    %77 = vector.broadcast %cst_68 : f32 to vector<8x64xf32>
    %78 = arith.maximumf %76, %77 : vector<8x64xf32>
    %c1_69 = arith.constant 1 : index
    %c0_70 = arith.constant 0 : index
    %c0_71 = arith.constant 0 : index
    %79 = vector.load %arg6[%c1_69, %c0_70, %c0_71] : memref<4x64x32xbf16, #tpu.memory_space<vmem>>, vector<1x64x32xbf16>
    %80 = vector.shape_cast %79 : vector<1x64x32xbf16> to vector<64x32xbf16>
    %81 = arith.truncf %78 : vector<8x64xf32> to vector<8x64xbf16>
    %cst_72 = arith.constant dense<0.000000e+00> : vector<8x32xf32>
    %82 = tpu.matmul %81, %80, %cst_72 {dimension_numbers = #tpu.dot_dimension_numbers<[1], [0], [0], [1], [0, 0, 1, 1], [], []>} : vector<8x64xbf16>, vector<64x32xbf16>, vector<8x32xf32> -> vector<8x32xf32>
    %83 = arith.addf %56, %82 : vector<8x32xf32>
    %c0_73 = arith.constant 0 : index
    %c0_74 = arith.constant 0 : index
    %84 = vector.load %arg5[%c0_73, %c0_74] : memref<1x64xf32, #tpu.memory_space<vmem>>, vector<1x64xf32>
    %c32_75 = arith.constant 32 : index
    %c0_76 = arith.constant 0 : index
    %85 = vector.load %arg23[%c32_75, %c0_76] : memref<80x80xf32, #tpu.memory_space<vmem>>, vector<8x80xf32>
    %c0_77 = arith.constant 0 : index
    %c0_78 = arith.constant 0 : index
    %c0_79 = arith.constant 0 : index
    %86 = vector.load %arg4[%c0_77, %c0_78, %c0_79] : memref<3x80x64xbf16, #tpu.memory_space<vmem>>, vector<1x80x64xbf16>
    %87 = vector.shape_cast %86 : vector<1x80x64xbf16> to vector<80x64xbf16>
    %88 = arith.truncf %85 : vector<8x80xf32> to vector<8x80xbf16>
    %cst_80 = arith.constant dense<0.000000e+00> : vector<8x64xf32>
    %89 = tpu.matmul %88, %87, %cst_80 {dimension_numbers = #tpu.dot_dimension_numbers<[1], [0], [0], [1], [0, 0, 1, 1], [], []>} : vector<8x80xbf16>, vector<80x64xbf16>, vector<8x64xf32> -> vector<8x64xf32>
    %90 = vector.broadcast %84 : vector<1x64xf32> to vector<8x64xf32>
    %91 = arith.addf %90, %89 : vector<8x64xf32>
    %c40 = arith.constant 40 : index
    %c0_81 = arith.constant 0 : index
    %92 = vector.load %arg23[%c40, %c0_81] : memref<80x80xf32, #tpu.memory_space<vmem>>, vector<8x80xf32>
    %c1_82 = arith.constant 1 : index
    %c0_83 = arith.constant 0 : index
    %c0_84 = arith.constant 0 : index
    %93 = vector.load %arg4[%c1_82, %c0_83, %c0_84] : memref<3x80x64xbf16, #tpu.memory_space<vmem>>, vector<1x80x64xbf16>
    %94 = vector.shape_cast %93 : vector<1x80x64xbf16> to vector<80x64xbf16>
    %95 = arith.truncf %92 : vector<8x80xf32> to vector<8x80xbf16>
    %cst_85 = arith.constant dense<0.000000e+00> : vector<8x64xf32>
    %96 = tpu.matmul %95, %94, %cst_85 {dimension_numbers = #tpu.dot_dimension_numbers<[1], [0], [0], [1], [0, 0, 1, 1], [], []>} : vector<8x80xbf16>, vector<80x64xbf16>, vector<8x64xf32> -> vector<8x64xf32>
    %97 = arith.addf %91, %96 : vector<8x64xf32>
    %c48 = arith.constant 48 : index
    %c0_86 = arith.constant 0 : index
    %98 = vector.load %arg23[%c48, %c0_86] : memref<80x80xf32, #tpu.memory_space<vmem>>, vector<8x80xf32>
    %c2_87 = arith.constant 2 : index
    %c0_88 = arith.constant 0 : index
    %c0_89 = arith.constant 0 : index
    %99 = vector.load %arg4[%c2_87, %c0_88, %c0_89] : memref<3x80x64xbf16, #tpu.memory_space<vmem>>, vector<1x80x64xbf16>
    %100 = vector.shape_cast %99 : vector<1x80x64xbf16> to vector<80x64xbf16>
    %101 = arith.truncf %98 : vector<8x80xf32> to vector<8x80xbf16>
    %cst_90 = arith.constant dense<0.000000e+00> : vector<8x64xf32>
    %102 = tpu.matmul %101, %100, %cst_90 {dimension_numbers = #tpu.dot_dimension_numbers<[1], [0], [0], [1], [0, 0, 1, 1], [], []>} : vector<8x80xbf16>, vector<80x64xbf16>, vector<8x64xf32> -> vector<8x64xf32>
    %103 = arith.addf %97, %102 : vector<8x64xf32>
    %cst_91 = arith.constant 0.000000e+00 : f32
    %104 = vector.broadcast %cst_91 : f32 to vector<8x64xf32>
    %105 = arith.maximumf %103, %104 : vector<8x64xf32>
    %c2_92 = arith.constant 2 : index
    %c0_93 = arith.constant 0 : index
    %c0_94 = arith.constant 0 : index
    %106 = vector.load %arg6[%c2_92, %c0_93, %c0_94] : memref<4x64x32xbf16, #tpu.memory_space<vmem>>, vector<1x64x32xbf16>
    %107 = vector.shape_cast %106 : vector<1x64x32xbf16> to vector<64x32xbf16>
    %108 = arith.truncf %105 : vector<8x64xf32> to vector<8x64xbf16>
    %cst_95 = arith.constant dense<0.000000e+00> : vector<8x32xf32>
    %109 = tpu.matmul %108, %107, %cst_95 {dimension_numbers = #tpu.dot_dimension_numbers<[1], [0], [0], [1], [0, 0, 1, 1], [], []>} : vector<8x64xbf16>, vector<64x32xbf16>, vector<8x32xf32> -> vector<8x32xf32>
    %110 = arith.addf %83, %109 : vector<8x32xf32>
    %c0_96 = arith.constant 0 : index
    %c0_97 = arith.constant 0 : index
    %111 = vector.load %arg5[%c0_96, %c0_97] : memref<1x64xf32, #tpu.memory_space<vmem>>, vector<1x64xf32>
    %c48_98 = arith.constant 48 : index
    %c0_99 = arith.constant 0 : index
    %112 = vector.load %arg23[%c48_98, %c0_99] : memref<80x80xf32, #tpu.memory_space<vmem>>, vector<8x80xf32>
    %c0_100 = arith.constant 0 : index
    %c0_101 = arith.constant 0 : index
    %c0_102 = arith.constant 0 : index
    %113 = vector.load %arg4[%c0_100, %c0_101, %c0_102] : memref<3x80x64xbf16, #tpu.memory_space<vmem>>, vector<1x80x64xbf16>
    %114 = vector.shape_cast %113 : vector<1x80x64xbf16> to vector<80x64xbf16>
    %115 = arith.truncf %112 : vector<8x80xf32> to vector<8x80xbf16>
    %cst_103 = arith.constant dense<0.000000e+00> : vector<8x64xf32>
    %116 = tpu.matmul %115, %114, %cst_103 {dimension_numbers = #tpu.dot_dimension_numbers<[1], [0], [0], [1], [0, 0, 1, 1], [], []>} : vector<8x80xbf16>, vector<80x64xbf16>, vector<8x64xf32> -> vector<8x64xf32>
    %117 = vector.broadcast %111 : vector<1x64xf32> to vector<8x64xf32>
    %118 = arith.addf %117, %116 : vector<8x64xf32>
    %c56 = arith.constant 56 : index
    %c0_104 = arith.constant 0 : index
    %119 = vector.load %arg23[%c56, %c0_104] : memref<80x80xf32, #tpu.memory_space<vmem>>, vector<8x80xf32>
    %c1_105 = arith.constant 1 : index
    %c0_106 = arith.constant 0 : index
    %c0_107 = arith.constant 0 : index
    %120 = vector.load %arg4[%c1_105, %c0_106, %c0_107] : memref<3x80x64xbf16, #tpu.memory_space<vmem>>, vector<1x80x64xbf16>
    %121 = vector.shape_cast %120 : vector<1x80x64xbf16> to vector<80x64xbf16>
    %122 = arith.truncf %119 : vector<8x80xf32> to vector<8x80xbf16>
    %cst_108 = arith.constant dense<0.000000e+00> : vector<8x64xf32>
    %123 = tpu.matmul %122, %121, %cst_108 {dimension_numbers = #tpu.dot_dimension_numbers<[1], [0], [0], [1], [0, 0, 1, 1], [], []>} : vector<8x80xbf16>, vector<80x64xbf16>, vector<8x64xf32> -> vector<8x64xf32>
    %124 = arith.addf %118, %123 : vector<8x64xf32>
    %c64 = arith.constant 64 : index
    %c0_109 = arith.constant 0 : index
    %125 = vector.load %arg23[%c64, %c0_109] : memref<80x80xf32, #tpu.memory_space<vmem>>, vector<8x80xf32>
    %c2_110 = arith.constant 2 : index
    %c0_111 = arith.constant 0 : index
    %c0_112 = arith.constant 0 : index
    %126 = vector.load %arg4[%c2_110, %c0_111, %c0_112] : memref<3x80x64xbf16, #tpu.memory_space<vmem>>, vector<1x80x64xbf16>
    %127 = vector.shape_cast %126 : vector<1x80x64xbf16> to vector<80x64xbf16>
    %128 = arith.truncf %125 : vector<8x80xf32> to vector<8x80xbf16>
    %cst_113 = arith.constant dense<0.000000e+00> : vector<8x64xf32>
    %129 = tpu.matmul %128, %127, %cst_113 {dimension_numbers = #tpu.dot_dimension_numbers<[1], [0], [0], [1], [0, 0, 1, 1], [], []>} : vector<8x80xbf16>, vector<80x64xbf16>, vector<8x64xf32> -> vector<8x64xf32>
    %130 = arith.addf %124, %129 : vector<8x64xf32>
    %cst_114 = arith.constant 0.000000e+00 : f32
    %131 = vector.broadcast %cst_114 : f32 to vector<8x64xf32>
    %132 = arith.maximumf %130, %131 : vector<8x64xf32>
    %c3 = arith.constant 3 : index
    %c0_115 = arith.constant 0 : index
    %c0_116 = arith.constant 0 : index
    %133 = vector.load %arg6[%c3, %c0_115, %c0_116] : memref<4x64x32xbf16, #tpu.memory_space<vmem>>, vector<1x64x32xbf16>
    %134 = vector.shape_cast %133 : vector<1x64x32xbf16> to vector<64x32xbf16>
    %135 = arith.truncf %132 : vector<8x64xf32> to vector<8x64xbf16>
    %cst_117 = arith.constant dense<0.000000e+00> : vector<8x32xf32>
    %136 = tpu.matmul %135, %134, %cst_117 {dimension_numbers = #tpu.dot_dimension_numbers<[1], [0], [0], [1], [0, 0, 1, 1], [], []>} : vector<8x64xbf16>, vector<64x32xbf16>, vector<8x32xf32> -> vector<8x32xf32>
    %137 = arith.addf %110, %136 : vector<8x32xf32>
    %c0_118 = arith.constant 0 : index
    %c0_119 = arith.constant 0 : index
    %138 = vector.load %arg7[%c0_118, %c0_119] : memref<1x32xf32, #tpu.memory_space<vmem>>, vector<1x32xf32>
    %139 = vector.broadcast %138 : vector<1x32xf32> to vector<8x32xf32>
    %140 = arith.addf %137, %139 : vector<8x32xf32>
    %cst_120 = arith.constant 0.000000e+00 : f32
    %141 = vector.broadcast %cst_120 : f32 to vector<8x32xf32>
    %142 = arith.maximumf %140, %141 : vector<8x32xf32>
    %c0_121 = arith.constant 0 : index
    %c0_122 = arith.constant 0 : index
    %143 = vector.load %arg1[%c0_121, %c0_122] : memref<8x35xf32, #tpu.memory_space<vmem>>, vector<8x35xf32>
    %144 = vector.extract_strided_slice %143 {offsets = [0, 0], sizes = [8, 16], strides = [1, 1]} : vector<8x35xf32> to vector<8x16xf32>
    %145 = vector.extract_strided_slice %143 {offsets = [0, 16], sizes = [8, 16], strides = [1, 1]} : vector<8x35xf32> to vector<8x16xf32>
    %146 = vector.extract_strided_slice %143 {offsets = [0, 32], sizes = [8, 3], strides = [1, 1]} : vector<8x35xf32> to vector<8x3xf32>
    %c0_123 = arith.constant 0 : index
    %c0_124 = arith.constant 0 : index
    %147 = vector.load %arg8[%c0_123, %c0_124] : memref<3x16xbf16, #tpu.memory_space<vmem>>, vector<3x16xbf16>
    %148 = arith.truncf %146 : vector<8x3xf32> to vector<8x3xbf16>
    %cst_125 = arith.constant dense<0.000000e+00> : vector<8x16xf32>
    %149 = tpu.matmul %148, %147, %cst_125 {dimension_numbers = #tpu.dot_dimension_numbers<[1], [0], [0], [1], [0, 0, 1, 1], [], []>} : vector<8x3xbf16>, vector<3x16xbf16>, vector<8x16xf32> -> vector<8x16xf32>
    %c0_126 = arith.constant 0 : index
    %c0_127 = arith.constant 0 : index
    %150 = vector.load %arg9[%c0_126, %c0_127] : memref<1x16xf32, #tpu.memory_space<vmem>>, vector<1x16xf32>
    %151 = vector.broadcast %150 : vector<1x16xf32> to vector<8x16xf32>
    %152 = arith.addf %149, %151 : vector<8x16xf32>
    %cst_128 = arith.constant 0.000000e+00 : f32
    %153 = vector.broadcast %cst_128 : f32 to vector<8x16xf32>
    %154 = arith.maximumf %152, %153 : vector<8x16xf32>
    %c0_129 = arith.constant 0 : index
    %c0_130 = arith.constant 0 : index
    %155 = vector.load %arg10[%c0_129, %c0_130] : memref<32x64xbf16, #tpu.memory_space<vmem>>, vector<32x64xbf16>
    %156 = arith.truncf %142 : vector<8x32xf32> to vector<8x32xbf16>
    %cst_131 = arith.constant dense<0.000000e+00> : vector<8x64xf32>
    %157 = tpu.matmul %156, %155, %cst_131 {dimension_numbers = #tpu.dot_dimension_numbers<[1], [0], [0], [1], [0, 0, 1, 1], [], []>} : vector<8x32xbf16>, vector<32x64xbf16>, vector<8x64xf32> -> vector<8x64xf32>
    %c0_132 = arith.constant 0 : index
    %c0_133 = arith.constant 0 : index
    %158 = vector.load %arg11[%c0_132, %c0_133] : memref<16x64xbf16, #tpu.memory_space<vmem>>, vector<16x64xbf16>
    %159 = arith.truncf %154 : vector<8x16xf32> to vector<8x16xbf16>
    %cst_134 = arith.constant dense<0.000000e+00> : vector<8x64xf32>
    %160 = tpu.matmul %159, %158, %cst_134 {dimension_numbers = #tpu.dot_dimension_numbers<[1], [0], [0], [1], [0, 0, 1, 1], [], []>} : vector<8x16xbf16>, vector<16x64xbf16>, vector<8x64xf32> -> vector<8x64xf32>
    %161 = arith.addf %157, %160 : vector<8x64xf32>
    %c0_135 = arith.constant 0 : index
    %c0_136 = arith.constant 0 : index
    %162 = vector.load %arg12[%c0_135, %c0_136] : memref<16x64xbf16, #tpu.memory_space<vmem>>, vector<16x64xbf16>
    %163 = arith.truncf %144 : vector<8x16xf32> to vector<8x16xbf16>
    %cst_137 = arith.constant dense<0.000000e+00> : vector<8x64xf32>
    %164 = tpu.matmul %163, %162, %cst_137 {dimension_numbers = #tpu.dot_dimension_numbers<[1], [0], [0], [1], [0, 0, 1, 1], [], []>} : vector<8x16xbf16>, vector<16x64xbf16>, vector<8x64xf32> -> vector<8x64xf32>
    %165 = arith.addf %161, %164 : vector<8x64xf32>
    %c0_138 = arith.constant 0 : index
    %c0_139 = arith.constant 0 : index
    %166 = vector.load %arg13[%c0_138, %c0_139] : memref<1x64xf32, #tpu.memory_space<vmem>>, vector<1x64xf32>
    %167 = vector.broadcast %166 : vector<1x64xf32> to vector<8x64xf32>
    %168 = arith.addf %165, %167 : vector<8x64xf32>
    %cst_140 = arith.constant 0.000000e+00 : f32
    %169 = vector.broadcast %cst_140 : f32 to vector<8x64xf32>
    %170 = arith.maximumf %168, %169 : vector<8x64xf32>
    %c0_141 = arith.constant 0 : index
    %c0_142 = arith.constant 0 : index
    %171 = vector.load %arg14[%c0_141, %c0_142] : memref<64x32xbf16, #tpu.memory_space<vmem>>, vector<64x32xbf16>
    %172 = arith.truncf %170 : vector<8x64xf32> to vector<8x64xbf16>
    %cst_143 = arith.constant dense<0.000000e+00> : vector<8x32xf32>
    %173 = tpu.matmul %172, %171, %cst_143 {dimension_numbers = #tpu.dot_dimension_numbers<[1], [0], [0], [1], [0, 0, 1, 1], [], []>} : vector<8x64xbf16>, vector<64x32xbf16>, vector<8x32xf32> -> vector<8x32xf32>
    %c0_144 = arith.constant 0 : index
    %c0_145 = arith.constant 0 : index
    %174 = vector.load %arg15[%c0_144, %c0_145] : memref<1x32xf32, #tpu.memory_space<vmem>>, vector<1x32xf32>
    %175 = vector.broadcast %174 : vector<1x32xf32> to vector<8x32xf32>
    %176 = arith.addf %173, %175 : vector<8x32xf32>
    %177 = vector.extract_strided_slice %176 {offsets = [0, 0], sizes = [8, 16], strides = [1, 1]} : vector<8x32xf32> to vector<8x16xf32>
    %178 = vector.extract_strided_slice %176 {offsets = [0, 16], sizes = [8, 16], strides = [1, 1]} : vector<8x32xf32> to vector<8x16xf32>
    %cst_146 = arith.constant 5.000000e-01 : f32
    %179 = vector.broadcast %cst_146 : f32 to vector<8x16xf32>
    %180 = arith.mulf %179, %178 : vector<8x16xf32>
    %181 = math.exp %180 : vector<8x16xf32>
    %182 = arith.mulf %181, %145 : vector<8x16xf32>
    %183 = arith.addf %177, %182 : vector<8x16xf32>
    %c0_147 = arith.constant 0 : index
    %c0_148 = arith.constant 0 : index
    %184 = vector.load %arg16[%c0_147, %c0_148] : memref<16x64xbf16, #tpu.memory_space<vmem>>, vector<16x64xbf16>
    %185 = arith.truncf %183 : vector<8x16xf32> to vector<8x16xbf16>
    %cst_149 = arith.constant dense<0.000000e+00> : vector<8x64xf32>
    %186 = tpu.matmul %185, %184, %cst_149 {dimension_numbers = #tpu.dot_dimension_numbers<[1], [0], [0], [1], [0, 0, 1, 1], [], []>} : vector<8x16xbf16>, vector<16x64xbf16>, vector<8x64xf32> -> vector<8x64xf32>
    %c0_150 = arith.constant 0 : index
    %c0_151 = arith.constant 0 : index
    %187 = vector.load %arg17[%c0_150, %c0_151] : memref<32x64xbf16, #tpu.memory_space<vmem>>, vector<32x64xbf16>
    %188 = arith.truncf %142 : vector<8x32xf32> to vector<8x32xbf16>
    %cst_152 = arith.constant dense<0.000000e+00> : vector<8x64xf32>
    %189 = tpu.matmul %188, %187, %cst_152 {dimension_numbers = #tpu.dot_dimension_numbers<[1], [0], [0], [1], [0, 0, 1, 1], [], []>} : vector<8x32xbf16>, vector<32x64xbf16>, vector<8x64xf32> -> vector<8x64xf32>
    %190 = arith.addf %186, %189 : vector<8x64xf32>
    %c0_153 = arith.constant 0 : index
    %c0_154 = arith.constant 0 : index
    %191 = vector.load %arg18[%c0_153, %c0_154] : memref<16x64xbf16, #tpu.memory_space<vmem>>, vector<16x64xbf16>
    %192 = arith.truncf %154 : vector<8x16xf32> to vector<8x16xbf16>
    %cst_155 = arith.constant dense<0.000000e+00> : vector<8x64xf32>
    %193 = tpu.matmul %192, %191, %cst_155 {dimension_numbers = #tpu.dot_dimension_numbers<[1], [0], [0], [1], [0, 0, 1, 1], [], []>} : vector<8x16xbf16>, vector<16x64xbf16>, vector<8x64xf32> -> vector<8x64xf32>
    %194 = arith.addf %190, %193 : vector<8x64xf32>
    %c0_156 = arith.constant 0 : index
    %c0_157 = arith.constant 0 : index
    %195 = vector.load %arg19[%c0_156, %c0_157] : memref<1x64xf32, #tpu.memory_space<vmem>>, vector<1x64xf32>
    %196 = vector.broadcast %195 : vector<1x64xf32> to vector<8x64xf32>
    %197 = arith.addf %194, %196 : vector<8x64xf32>
    %cst_158 = arith.constant 0.000000e+00 : f32
    %198 = vector.broadcast %cst_158 : f32 to vector<8x64xf32>
    %199 = arith.maximumf %197, %198 : vector<8x64xf32>
    %c0_159 = arith.constant 0 : index
    %c0_160 = arith.constant 0 : index
    %200 = vector.load %arg20[%c0_159, %c0_160] : memref<64x16xbf16, #tpu.memory_space<vmem>>, vector<64x16xbf16>
    %201 = arith.truncf %199 : vector<8x64xf32> to vector<8x64xbf16>
    %cst_161 = arith.constant dense<0.000000e+00> : vector<8x16xf32>
    %202 = tpu.matmul %201, %200, %cst_161 {dimension_numbers = #tpu.dot_dimension_numbers<[1], [0], [0], [1], [0, 0, 1, 1], [], []>} : vector<8x64xbf16>, vector<64x16xbf16>, vector<8x16xf32> -> vector<8x16xf32>
    %c0_162 = arith.constant 0 : index
    %c0_163 = arith.constant 0 : index
    %203 = vector.load %arg21[%c0_162, %c0_163] : memref<1x16xf32, #tpu.memory_space<vmem>>, vector<1x16xf32>
    %204 = vector.broadcast %203 : vector<1x16xf32> to vector<8x16xf32>
    %205 = arith.addf %202, %204 : vector<8x16xf32>
    %c0_164 = arith.constant 0 : index
    %c0_165 = arith.constant 0 : index
    %206 = vector.load %arg22[%c0_164, %c0_165] : memref<8x48xf32, #tpu.memory_space<vmem>>, vector<8x32xf32>
    tpu.vector_store %arg22[%c0_164, %c0_165], %176 {strides = array<i32>} : memref<8x48xf32, #tpu.memory_space<vmem>>, vector<8x32xf32>,
    %c0_166 = arith.constant 0 : index
    %c32_167 = arith.constant 32 : index
    %207 = vector.load %arg22[%c0_166, %c32_167] : memref<8x48xf32, #tpu.memory_space<vmem>>, vector<8x16xf32>
    tpu.vector_store %arg22[%c0_166, %c32_167], %205 {strides = array<i32>} : memref<8x48xf32, #tpu.memory_space<vmem>>, vector<8x16xf32>,
    return
  }
}

</mosaic_0001>

<bundles_post_ra>
// kernel: mtg_forward.1
= control target key start
LH: loop header
LB: loop body
LE: loop exit
PB: predicated region body
PF: predicated region fallthrough
CT: control target
= control target key end

     0   :  { %vm110_vm0 = vcmask 1040384   ;;  %vm97_vm1 = vcmask 146432   ;;  %v2766_v31 = vmov 0.0   ;;  %vm2767_vm2 = vmmov 0   ;;  %s2768_s28 = smov 96   ;;  %s3459_s2 = inlined_call_operand.vmem [shape: bf16[3,18,80], index: 2, kind: input, shape index: {}]   ;;  %s3460_s0 = inlined_call_operand.vmem [shape: f32[3,64,18], index: 0, kind: input, shape index: {}]   ;;  %s3461_s4 = inlined_call_operand.vmem [shape: bf16[3,80,64], index: 4, kind: input, shape index: {}]   ;;  %s3462_s3 = inlined_call_operand.vmem [shape: f32[1,80], index: 3, kind: input, shape index: {}]   ;;  %s3463_s6 = inlined_call_operand.vmem [shape: bf16[4,64,32], index: 6, kind: input, shape index: {}]   ;;  %s3464_s5 = inlined_call_operand.vmem [shape: f32[1,64], index: 5, kind: input, shape index: {}]   ;;  %s3465_s1 = inlined_call_operand.vmem [shape: f32[8,35], index: 1, kind: input, shape index: {}]   ;;  %s3466_s8 = inlined_call_operand.vmem [shape: bf16[3,16], index: 8, kind: input, shape index: {}]   ;;  %s3467_s10 = inlined_call_operand.vmem [shape: bf16[32,64], index: 10, kind: input, shape index: {}]   ;;  %s3468_s11 = inlined_call_operand.vmem [shape: bf16[16,64], index: 11, kind: input, shape index: {}]   ;;  %s3469_s12 = inlined_call_operand.vmem [shape: bf16[16,64], index: 12, kind: input, shape index: {}]   ;;  %s3470_s17 = inlined_call_operand.vmem [shape: bf16[32,64], index: 17, kind: input, shape index: {}]   ;;  %s3471_s7 = inlined_call_operand.vmem [shape: f32[1,32], index: 7, kind: input, shape index: {}]   ;;  %s3472_s9 = inlined_call_operand.vmem [shape: f32[1,16], index: 9, kind: input, shape index: {}]   ;;  %s3473_s14 = inlined_call_operand.vmem [shape: bf16[64,32], index: 14, kind: input, shape index: {}]   ;;  %s3474_s18 = inlined_call_operand.vmem [shape: bf16[16,64], index: 18, kind: input, shape index: {}]   ;;  %s3475_s13 = inlined_call_operand.vmem [shape: f32[1,64], index: 13, kind: input, shape index: {}]   ;;  %s3476_s16 = inlined_call_operand.vmem [shape: bf16[16,64], index: 16, kind: input, shape index: {}]   ;;  %s3477_s15 = inlined_call_operand.vmem [shape: f32[1,32], index: 15, kind: input, shape index: {}]   ;;  %s3478_s22 = inlined_call_operand.vmem [shape: f32[8,48], index: 22, kind: output, shape index: {}]   ;;  %s3479_s20 = inlined_call_operand.vmem [shape: bf16[64,16], index: 20, kind: input, shape index: {}]   ;;  %s3480_s19 = inlined_call_operand.vmem [shape: f32[1,64], index: 19, kind: input, shape index: {}]   ;;  %s3481_s21 = inlined_call_operand.vmem [shape: f32[1,16], index: 21, kind: input, shape index: {}]  }
   0x1   :  { %3486 = sst [smem:[#allocation3_spill]] %s3459_s2  ;;  %vm429_vm3 = vcmask 654336   ;;  %vm885_vm4 = vcmask 523264   ;;  %vm1446_vm5 = vcmask 1041408   ;;  %vm1442_vm6 = vcmask 23552  }
   0x2   :  { %3487 = sst [smem:[#allocation4_spill]] %s3460_s0  ;;  %s3493_s29 = sld [smem:[#allocation3_spill]]  ;;  %430 = vst.msk [vmem:[#allocation2] sm:$0xff] %vm429_vm3, %v2766_v31  ;;  %vm1563_vm7 = vcmask 261120   ;;  %vm1507_vm8 = vcmask 130048   ;;  %vm2014_vm9 = vcmask 392448  }
   0x3   :  { %3488 = sst [smem:[#allocation5_spill]] %s3461_s4  ;;  %s3494_s0 = sld [smem:[#allocation4_spill]] }
   0x4   :  { %3489 = sst [smem:[#allocation6_spill]] %s3462_s3 }
   0x5   :  { %3490 = sst [smem:[#allocation7_spill]] %s3463_s6  ;;  %s3496_s30 = sld [smem:[#allocation6_spill]] }
   0x6   :  { %3491 = sst [smem:[#allocation8_spill]] %s3464_s5  ;;  %s3497_s3 = sld [smem:[#allocation7_spill]] }
   0x7   :  { %3492 = sst [smem:[#allocation9_spill]] %s3465_s1  ;;  %s3498_s1 = sld [smem:[#allocation8_spill]] }
   0x8   :  { %v2711_v0 = vld [vmem:[%s3493_s29 + $0xc] sm:$0xff]   ;;  %v2712_v1 = vld [vmem:[%s3493_s29 + $0x14] ss:$0 sps:$4 sm:$0x11]   ;;  %v2713_v7 = vld [vmem:[%s3493_s29 + $0x18] sm:$0xff]   ;;  %s3499_s27 = sld [smem:[#allocation9_spill]] }
   0x9   :  { %v2027_v2 = vld [vmem:[%s3494_s0 + $0x40] sm:$0xff]  ;;  %2332 = vmatprep.subr.bf16.mxu0 %v2711_v0  ;;  %v2028_v3 = vld [vmem:[%s3494_s0 + $0x48] sm:$0xff]  ;;  %v2029_v4 = vld [vmem:[%s3494_s0 + $0x50] sm:$0xff]  ;;  %v232_v8 = vsel %vm110_vm0, %v2712_v1, 0 }
   0xa   :  { %v2030_v5 = vld [vmem:[%s3494_s0 + $0x58] sm:$0xff]  ;;  %2333 = vmatpush3.bf16.msra.mxu0 %v2711_v0  ;;  %v206_v6 = vpack.c.bf16 %v2028_v3, %v2027_v2  ;;  %v2714_v9 = vld [vmem:[%s3493_s29] sm:$0xff]   ;;  %v2032_v11 = vld [vmem:[%s3494_s0 + $0x68] sm:$0xff] }
   0xb   :  { %2703 = vmatprep.subr.msk.bf16.mxu0 %vm110_vm0, %v2712_v1  ;;  %v2031_v10 = vld [vmem:[%s3494_s0 + $0x60] sm:$0xff]  ;;  %v207_v12 = vpack.c.bf16 %v2030_v5, %v2029_v4  ;;  %2320 = vmatprep.subr.bf16.mxu1 %v2714_v9  ;;  %v2715_v13 = vld [vmem:[%s3493_s29 + $0x8] ss:$0 sps:$4 sm:$0x11]   ;;  %v75_v18 = vld [vmem:[%s3494_s0 + $0x10] sm:$0xff] }
   0xc   :  { %2336 = vmatprep.mubr.msk.bf16.mxu0 %vm97_vm1, %v206_v6  ;;  %2321 = vmatpush3.bf16.msra.mxu1 %v2714_v9  ;;  %v208_v14 = vpack.c.bf16 %v2032_v11, %v2031_v10  ;;  %v2716_v15 = vld [vmem:[%s3493_s29 + $0x20] ss:$0 sps:$4 sm:$0x11]   ;;  %v74_v17 = vld [vmem:[%s3494_s0 + $0x8] sm:$0xff]  ;;  %v76_v19 = vld [vmem:[%s3494_s0 + $0x18] sm:$0xff]  ;;  %v112_v20 = vsel %vm110_vm0, %v2715_v13, 0 }
   0xd   :  { %v73_v16 = vld [vmem:[%s3494_s0] sm:$0xff]  ;;  %2702 = vmatprep.subr.msk.bf16.mxu1 %vm110_vm0, %v2715_v13  ;;  %v78_v23 = vld [vmem:[%s3494_s0 + $0x28] sm:$0xff]  ;;  %v2033_v24 = vld [vmem:[%s3494_s0 + $0x70] sm:$0xff]  ;;  %v85_v26 = vpack.c.bf16 %v76_v19, %v75_v18  ;;  %v346_v27 = vsel %vm110_vm0, %v2716_v15, 0  ;;  %s3495_s29 = sld [smem:[#allocation5_spill]] }
   0xe   :  { %2335 = vmatpush3.bf16.msra.mxu0 %v232_v8  ;;  %v84_v21 = vpack.c.bf16 %v74_v17, %v73_v16  ;;  %v77_v22 = vld [vmem:[%s3494_s0 + $0x20] sm:$0xff]  ;;  %v2034_v25 = vld [vmem:[%s3494_s0 + $0x78] sm:$0xff]  ;;  %v2045_v29 = vld [vmem:[%s3494_s0 + $0x88] sm:$0xff] }
   0xf   :  { %2344 = vmatprep.subr.bf16.mxu0 %v2713_v7  ;;  %v2044_v28 = vld [vmem:[%s3494_s0 + $0x80] sm:$0xff]  ;;  %v86_v30 = vpack.c.bf16 %v78_v23, %v77_v22  ;;  %v209_v33 = vpack.c.bf16 %v2034_v25, %v2033_v24  ;;  %v79_v34 = vld [vmem:[%s3494_s0 + $0x30] sm:$0xff]  ;;  %v80_v36 = vld [vmem:[%s3494_s0 + $0x38] sm:$0xff] }
  0x10   :  { %2323 = vmatpush3.bf16.msra.mxu1 %v112_v20  ;;  %2324 = vmatprep.mubr.msk.bf16.mxu1 %vm97_vm1, %v84_v21  ;;  %v320_v35 = vpack.c.bf16 %v2045_v29, %v2044_v28  ;;  %v2046_v38 = vld [vmem:[%s3494_s0 + $0x90] sm:$0xff]  ;;  %v2047_v39 = vld [vmem:[%s3494_s0 + $0x98] sm:$0xff]  ;;  %v2048_v40 = vld [vmem:[%s3494_s0 + $0xa0] sm:$0xff]  ;;  %v87_v43 = vpack.c.bf16 %v80_v36, %v79_v34 }
  0x11   :  { %2337 = vmatmul.mubr.msk.bf16.vlgmr.msra.gmra.mrb[0].mxu0 %vm97_vm1, %v207_v12  ;;  %2356 = vmatprep.subr.bf16.mxu1 %v2766_v31  ;;  %v2049_v41 = vld [vmem:[%s3494_s0 + $0xa8] sm:$0xff]  ;;  %v321_v44 = vpack.c.bf16 %v2047_v39, %v2046_v38  ;;  %v2050_v47 = vld [vmem:[%s3494_s0 + $0xb0] sm:$0xff]  ;;  %v2051_v48 = vld [vmem:[%s3494_s0 + $0xb8] sm:$0xff] }
  0x12   :  { %2345 = vmatpush3.bf16.msra.mxu0 %v2713_v7  ;;  %2340 = vmatprep.mubr.msk.bf16.mxu0 %vm97_vm1, %v208_v14  ;;  %v322_v46 = vpack.c.bf16 %v2049_v41, %v2048_v40  ;;  %v323_v50 = vpack.c.bf16 %v2051_v48, %v2050_v47  ;;  %v441_v51 = vld [vmem:[#allocation2] sm:$0xff] }
  0x13   :  { %2704 = vmatprep.subr.msk.bf16.mxu0 %vm110_vm0, %v2716_v15  ;;  %v2967_v32 = vld [vmem:[%s3495_s29] sm:$0xff]   ;;  %2325 = vmatmul.mubr.msk.bf16.vlgmr.msra.gmra.mrb[0].mxu1 %vm97_vm1, %v85_v26  ;;  %v2981_v37 = vld [vmem:[%s3495_s29 + $0x8] sm:$0xff]   ;;  %v3001_v42 = vld [vmem:[%s3495_s29 + $0x10] sm:$0xff]   ;;  %v452_v53 = vpack.c.bf16 %v441_v51, %v441_v51 }
  0x14   :  { %2328 = vmatprep.mubr.msk.bf16.mxu1 %vm97_vm1, %v86_v30  ;;  %2357 = vmatpush3.bf16.msra.mxu1 %v2967_v32  ;;  %v3009_v45 = vld [vmem:[%s3495_s29 + $0x18] sm:$0xff]   ;;  %v3029_v49 = vld [vmem:[%s3495_s29 + $0x20] sm:$0xff]   ;;  %v3051_v52 = vld [vmem:[%s3495_s29 + $0x28] sm:$0xff]  }
  0x15   :  { %2358 = vmatprep.subr.bf16.mxu1 %v2766_v31  ;;  %v3061_v54 = vld [vmem:[%s3495_s29 + $0x30] sm:$0xff]   ;;  %v3068_v55 = vld [vmem:[%s3495_s29 + $0x38] sm:$0xff]   ;;  %v3075_v56 = vld [vmem:[%s3495_s29 + $0x40] sm:$0xff]  }
  0x16   :  { %2347 = vmatpush3.bf16.msra.mxu0 %v346_v27  ;;  %v3082_v57 = vld [vmem:[%s3495_s29 + $0x48] sm:$0xff]   ;;  %v2026_v62 = vld [vmem:[%s3496_s30] ss:$0 sm:$0xff]  ;;  %v3097_v38 = vld [vmem:[%s3495_s29 + $0x50] sm:$0xff]  }
  0x17   :  { %2398 = vmatprep.subr.bf16.mxu0 %v2766_v31  ;;  %v3130_v47 = vld [vmem:[%s3495_s29 + $0x68] sm:$0xff]   ;;  %v3139_v48 = vld [vmem:[%s3495_s29 + $0x70] sm:$0xff]  }
  0x18   :  { %2359 = vmatpush3.bf16.msra.mxu1 %v2981_v37 }
  0x19   :  { %2341 = vmatmul.mubr.msk.bf16.gmra.mrb[4].mxu0 %vm97_vm1, %v209_v33  ;;  %2360 = vmatprep.subr.bf16.mxu1 %v2766_v31 }
  0x1a   :  { %2348 = vmatprep.mubr.msk.bf16.mxu0 %vm97_vm1, %v320_v35 }
  0x1b   :  { %2329 = vmatmul.mubr.msk.bf16.gmra.mrb[4].mxu1 %vm97_vm1, %v87_v43 }
  0x1c   :  { %2361 = vmatpush3.bf16.msra.mxu1 %v3001_v42  ;;  %2366 = vmatprep.mubr.msk.bf16.mxu1 %vm2767_vm2, %v2766_v31 }
  0x1d   :  { %2362 = vmatprep.subr.bf16.mxu1 %v2766_v31 }
  0x20   :  { %2363 = vmatpush3.bf16.msra.mxu1 %v3009_v45 }
  0x21   :  { %2349 = vmatmul.mubr.msk.bf16.vlgmr.msra.gmra.mrb[0].mxu0 %vm97_vm1, %v321_v44  ;;  %2364 = vmatprep.subr.bf16.mxu1 %v2766_v31  ;;  %v3107_v44 = vld [vmem:[%s3495_s29 + $0x58] sm:$0xff]  }
  0x22   :  { %2352 = vmatprep.mubr.msk.bf16.mxu0 %vm97_vm1, %v322_v46  ;;  %2399 = vmatpush3.bf16.msra.mxu0 %v2967_v32  ;;  %v3121_v46 = vld [vmem:[%s3495_s29 + $0x60] sm:$0xff]  }
  0x23   :  { %2400 = vmatprep.subr.bf16.mxu0 %v2766_v31 }
  0x24   :  { %2365 = vmatpush3.bf16.msra.mxu1 %v3029_v49 }
  0x25   :  { %2370 = vmatprep.subr.bf16.mxu1 %v2766_v31 }
  0x26   :  { %2401 = vmatpush3.bf16.msra.mxu0 %v2981_v37 }
  0x27   :  { %2402 = vmatprep.subr.bf16.mxu0 %v2766_v31  ;;  %2367 = vmatmul.mubr.msk.bf16.vlgmr.msra.gmra.mrb[8].mxu1 %vm429_vm3, %v452_v53 }
  0x28   :  { %2371 = vmatpush3.bf16.msra.mxu1 %v3051_v52  ;;  %2380 = vmatprep.mubr.msk.bf16.mxu1 %vm2767_vm2, %v2766_v31 }
  0x29   :  { %2353 = vmatmul.mubr.msk.bf16.gmra.mrb[4].mxu0 %vm97_vm1, %v323_v50  ;;  %2372 = vmatprep.subr.bf16.mxu1 %v2766_v31 }
  0x2a   :  { %2403 = vmatpush3.bf16.msra.mxu0 %v3001_v42  ;;  %2408 = vmatprep.mubr.msk.bf16.mxu0 %vm2767_vm2, %v2766_v31 }
  0x2b   :  { %2404 = vmatprep.subr.bf16.mxu0 %v2766_v31 }
  0x2c   :  { %2373 = vmatpush3.bf16.msra.mxu1 %v3061_v54 }
  0x2d   :  { %2374 = vmatprep.subr.bf16.mxu1 %v2766_v31 }
  0x2e   :  { %2405 = vmatpush3.bf16.msra.mxu0 %v3009_v45 }
  0x2f   :  { %2406 = vmatprep.subr.bf16.mxu0 %v2766_v31 }
  0x30   :  { %2375 = vmatpush3.bf16.msra.mxu1 %v3068_v55 }
  0x31   :  { %2376 = vmatprep.subr.bf16.mxu1 %v2766_v31 }
  0x32   :  { %2407 = vmatpush3.bf16.msra.mxu0 %v3029_v49 }
  0x33   :  { %2412 = vmatprep.subr.bf16.mxu0 %v2766_v31 }
  0x34   :  { %2377 = vmatpush3.bf16.msra.mxu1 %v3075_v56 }
  0x35   :  { %2378 = vmatprep.subr.bf16.mxu1 %v2766_v31 }
  0x38   :  { %2379 = vmatpush3.bf16.msra.mxu1 %v3082_v57 }
  0x39   :  { %2384 = vmatprep.subr.bf16.mxu1 %v2766_v31 }
  0xe6   :  { %v2326_v58 = vpop.f32.mrb[0].mxu1 }
  0xe7   :  { %v148_v59 = vpop.f32.mrb[1].mxu1  ;;  %v187_v63 = vadd.f32 %v2326_v58, %v2026_v62 }
  0xe8   :  { %v2327_v60 = vpop.f32.mrb[2].mxu1  ;;  %v185_v1 = vadd.f32 %v2026_v62, %v148_v59  ;;  %v2732_v59 = vld [vmem:[%s3497_s3 + $0x20] sm:$0xff]  }
  0xe9   :  { %v151_v61 = vpop.f32.mrb[3].mxu1  ;;  %v188_v6 = vadd.f32 %v2327_v60, %v2026_v62  ;;  %v2733_v60 = vld [vmem:[%s3497_s3 + $0x28] sm:$0xff]  }
  0xea   :  { %v186_v9 = vadd.f32 %v2026_v62, %v151_v61  ;;  %v2734_v61 = vld [vmem:[%s3497_s3 + $0x30] sm:$0xff]  }
  0xee   :  { %v2330_v0 = vpop.f32.mrb[4].mxu1 }
  0xef   :  { %v164_v2 = vpop.f32.mrb[5].mxu1  ;;  %v191_v18 = vadd.f32 %v2330_v0, %v2026_v62 }
  0xf0   :  { %v2331_v3 = vpop.f32.mrb[6].mxu1  ;;  %v189_v20 = vadd.f32 %v2026_v62, %v164_v2 }
  0xf1   :  { %v167_v5 = vpop.f32.mrb[7].mxu1  ;;  %v192_v21 = vadd.f32 %v2331_v3, %v2026_v62  ;;  %v3186_v3 = vld [vmem:[%s3498_s1] ss:$0 sm:$0xff] }
  0xf2   :  { %v190_v23 = vadd.f32 %v2026_v62, %v167_v5  ;;  %v2735_v62 = vld [vmem:[%s3497_s3 + $0x38] sm:$0xff]  }
  0xf4   :  { %v2350_v4 = vpop.f32.mrb[0].mxu0 }
  0xf5   :  { %v2643_v7 = vadd.f32 %v2350_v4, %v187_v63  ;;  %v382_v8 = vpop.f32.mrb[1].mxu0 }
  0xf6   :  { %v2645_v10 = vadd.f32 %v382_v8, %v185_v1  ;;  %v2351_v11 = vpop.f32.mrb[2].mxu0 }
  0xf7   :  { %v423_v12 = vmax.f32 %v2643_v7, 0.0  ;;  %v2647_v13 = vadd.f32 %v2351_v11, %v188_v6  ;;  %v385_v14 = vpop.f32.mrb[3].mxu0 }
  0xf8   :  { %v421_v15 = vmax.f32 %v2645_v10, 0.0  ;;  %v2649_v16 = vadd.f32 %v385_v14, %v186_v9  ;;  %v2736_v10 = vld [vmem:[%s3497_s3] sm:$0xff]  }
  0xf9   :  { %434 = vst.msk [vmem:[#allocation2 + $0x18] sm:$0xff] %vm429_vm3, %v423_v12  ;;  %v424_v17 = vmax.f32 %v2647_v13, 0.0  ;;  %v2737_v12 = vld [vmem:[%s3497_s3 + $0x8] sm:$0xff]   ;;  %v2738_v13 = vld [vmem:[%s3497_s3 + $0x10] sm:$0xff]  }
  0xfa   :  { %432 = vst.msk [vmem:[#allocation2 + $0x8] sm:$0xff] %vm429_vm3, %v421_v15  ;;  %v422_v19 = vmax.f32 %v2649_v16, 0.0  ;;  %v2739_v15 = vld [vmem:[%s3497_s3 + $0x18] sm:$0xff]  }
  0xfb   :  { %435 = vst.msk [vmem:[#allocation2 + $0x20] sm:$0xff] %vm429_vm3, %v424_v17 }
  0xfc   :  { %433 = vst.msk [vmem:[#allocation2 + $0x10] sm:$0xff] %vm429_vm3, %v422_v19  ;;  %v2354_v22 = vpop.f32.mrb[4].mxu0 }
  0xfd   :  { %v2651_v24 = vadd.f32 %v2354_v22, %v191_v18  ;;  %v398_v25 = vpop.f32.mrb[5].mxu0  ;;  %v2740_v22 = vld [vmem:[%s3497_s3 + $0x40] sm:$0xff]  }
  0xfe   :  { %v2653_v26 = vadd.f32 %v398_v25, %v189_v20  ;;  %v2355_v27 = vpop.f32.mrb[6].mxu0  ;;  %v2743_v25 = vld [vmem:[%s3497_s3 + $0x58] sm:$0xff]  }
  0xff   :  { %v427_v28 = vmax.f32 %v2651_v24, 0.0  ;;  %v2655_v29 = vadd.f32 %v2355_v27, %v192_v21  ;;  %v401_v30 = vpop.f32.mrb[7].mxu0  ;;  %v2742_v24 = vld [vmem:[%s3497_s3 + $0x50] sm:$0xff]  }
 0x100   :  { %v425_v33 = vmax.f32 %v2653_v26, 0.0  ;;  %v2657_v34 = vadd.f32 %v401_v30, %v190_v23  ;;  %v758_v50 = vld [vmem:[#allocation2 + $0x18] sm:$0xff]  ;;  %v2741_v23 = vld [vmem:[%s3497_s3 + $0x48] sm:$0xff]  }
 0x101   :  { %438 = vst.msk [vmem:[#allocation2 + $0x38] sm:$0xff] %vm429_vm3, %v427_v28  ;;  %v428_v35 = vmax.f32 %v2655_v29, 0.0  ;;  %v533_v36 = vld [vmem:[#allocation2 + $0x8] sm:$0xff]  ;;  %v759_v51 = vpack.c.bf16 %v758_v50, %v758_v50 }
 0x102   :  { %436 = vst.msk [vmem:[#allocation2 + $0x28] sm:$0xff] %vm429_vm3, %v425_v33  ;;  %v426_v39 = vmax.f32 %v2657_v34, 0.0  ;;  %v545_v40 = vpack.c.bf16 %v533_v36, %v533_v36  ;;  %v804_v53 = vld [vmem:[#allocation2 + $0x20] sm:$0xff] }
 0x103   :  { %439 = vst.msk [vmem:[#allocation2 + $0x40] sm:$0xff] %vm429_vm3, %v428_v35  ;;  %v620_v41 = vld [vmem:[#allocation2 + $0x10] sm:$0xff]  ;;  %v805_v58 = vpack.c.bf16 %v804_v53, %v804_v53  ;;  %v3270_v33 = vld [vmem:[%s3499_s27] sm:$0xff] }
 0x104   :  { %437 = vst.msk [vmem:[#allocation2 + $0x30] sm:$0xff] %vm429_vm3, %v426_v39  ;;  %2381 = vmatmul.mubr.msk.bf16.vlgmr.msra.gmra.mrb[8].mxu1 %vm429_vm3, %v545_v40  ;;  %v632_v43 = vpack.c.bf16 %v620_v41, %v620_v41  ;;  %v3276_v36 = vpack.c.bf16 %v3270_v33, %v3270_v33 }
 0x105   :  { %2385 = vmatpush3.bf16.msra.mxu1 %v3097_v38  ;;  %2394 = vmatprep.mubr.msk.bf16.mxu1 %vm2767_vm2, %v2766_v31 }
 0x106   :  { %2409 = vmatmul.mubr.msk.bf16.vlgmr.msra.gmra.mrb[8].mxu0 %vm429_vm3, %v632_v43  ;;  %2386 = vmatprep.subr.bf16.mxu1 %v2766_v31 }
 0x107   :  { %2413 = vmatpush3.bf16.msra.mxu0 %v3051_v52  ;;  %2422 = vmatprep.mubr.msk.bf16.mxu0 %vm2767_vm2, %v2766_v31 }
 0x108   :  { %2414 = vmatprep.subr.bf16.mxu0 %v2766_v31  ;;  %1440 = vrot.lane.b32.xlu0 %v3276_v36, %s2768_s28 }
 0x109   :  { %2387 = vmatpush3.bf16.msra.mxu1 %v3107_v44  ;;  %v1037_v18 = vld [vmem:[#allocation2 + $0x28] sm:$0xff] }
 0x10a   :  { %2388 = vmatprep.subr.bf16.mxu1 %v2766_v31  ;;  %v1038_v19 = vpack.c.bf16 %v1037_v18, %v1037_v18  ;;  %v2154_v18 = vld [vmem:[%s3472_s9] ss:$0 sm:$0xff] }
 0x10b   :  { %2415 = vmatpush3.bf16.msra.mxu0 %v3061_v54  ;;  %v1083_v20 = vld [vmem:[#allocation2 + $0x30] sm:$0xff] }
 0x10c   :  { %2416 = vmatprep.subr.bf16.mxu0 %v2766_v31  ;;  %v1084_v21 = vpack.c.bf16 %v1083_v20, %v1083_v20 }
 0x10d   :  { %2389 = vmatpush3.bf16.msra.mxu1 %v3121_v46 }
 0x10e   :  { %2390 = vmatprep.subr.bf16.mxu1 %v2766_v31 }
 0x10f   :  { %2417 = vmatpush3.bf16.msra.mxu0 %v3068_v55 }
 0x110   :  { %2418 = vmatprep.subr.bf16.mxu0 %v2766_v31 }
 0x111   :  { %2391 = vmatpush3.bf16.msra.mxu1 %v3130_v47 }
 0x112   :  { %2392 = vmatprep.subr.bf16.mxu1 %v2766_v31 }
 0x113   :  { %2419 = vmatpush3.bf16.msra.mxu0 %v3075_v56 }
 0x114   :  { %2420 = vmatprep.subr.bf16.mxu0 %v2766_v31 }
 0x115   :  { %2393 = vmatpush3.bf16.msra.mxu1 %v3139_v48 }
 0x116   :  { %2440 = vmatprep.subr.bf16.mxu1 %v2766_v31 }
 0x117   :  { %2421 = vmatpush3.bf16.msra.mxu0 %v3082_v57 }
 0x118   :  { %2395 = vmatmul.mubr.msk.bf16.vlgmr.msra.gmra.mrb[8].mxu1 %vm429_vm3, %v632_v43  ;;  %2426 = vmatprep.subr.bf16.mxu0 %v2766_v31 }
 0x119   :  { %2448 = vmatprep.mubr.msk.bf16.mxu1 %vm2767_vm2, %v2766_v31  ;;  %2441 = vmatpush3.bf16.msra.mxu1 %v2732_v59 }
 0x11a   :  { %2423 = vmatmul.mubr.msk.bf16.vlgmr.msra.gmra.mrb[8].mxu0 %vm429_vm3, %v759_v51  ;;  %2442 = vmatprep.subr.bf16.mxu1 %v2766_v31 }
 0x11b   :  { %2427 = vmatpush3.bf16.msra.mxu0 %v3097_v38  ;;  %2436 = vmatprep.mubr.msk.bf16.mxu0 %vm2767_vm2, %v2766_v31 }
 0x11c   :  { %2428 = vmatprep.subr.bf16.mxu0 %v2766_v31 }
 0x11d   :  { %2443 = vmatpush3.bf16.msra.mxu1 %v2733_v60 }
 0x11e   :  { %2444 = vmatprep.subr.bf16.mxu1 %v2766_v31 }
 0x11f   :  { %2429 = vmatpush3.bf16.msra.mxu0 %v3107_v44 }
 0x120   :  { %2430 = vmatprep.subr.bf16.mxu0 %v2766_v31 }
 0x121   :  { %2445 = vmatpush3.bf16.msra.mxu1 %v2734_v61 }
 0x122   :  { %2446 = vmatprep.subr.bf16.mxu1 %v2766_v31 }
 0x123   :  { %2431 = vmatpush3.bf16.msra.mxu0 %v3121_v46 }
 0x124   :  { %2432 = vmatprep.subr.bf16.mxu0 %v2766_v31 }
 0x125   :  { %2447 = vmatpush3.bf16.msra.mxu1 %v2735_v62 }
 0x126   :  { %2452 = vmatprep.subr.bf16.mxu1 %v2766_v31 }
 0x127   :  { %2433 = vmatpush3.bf16.msra.mxu0 %v3130_v47 }
 0x128   :  { %2434 = vmatprep.subr.bf16.mxu0 %v2766_v31 }
 0x12b   :  { %2435 = vmatpush3.bf16.msra.mxu0 %v3139_v48 }
 0x12c   :  { %2506 = vmatprep.subr.bf16.mxu0 %v2766_v31 }
 0x12e   :  { %2437 = vmatmul.mubr.msk.bf16.vlgmr.msra.gmra.mrb[8].mxu0 %vm429_vm3, %v805_v58 }
 0x12f   :  { %2514 = vmatprep.mubr.msk.bf16.mxu0 %vm2767_vm2, %v2766_v31  ;;  %2507 = vmatpush3.bf16.msra.mxu0 %v2740_v22 }
 0x130   :  { %2508 = vmatprep.subr.bf16.mxu0 %v2766_v31 }
 0x133   :  { %2509 = vmatpush3.bf16.msra.mxu0 %v2741_v23 }
 0x134   :  { %2510 = vmatprep.subr.bf16.mxu0 %v2766_v31 }
 0x137   :  { %2511 = vmatpush3.bf16.msra.mxu0 %v2742_v24 }
 0x138   :  { %2512 = vmatprep.subr.bf16.mxu0 %v2766_v31 }
 0x13b   :  { %2513 = vmatpush3.bf16.msra.mxu0 %v2743_v25 }
 0x13c   :  { %2518 = vmatprep.subr.bf16.mxu0 %v2766_v31 }
 0x1eb   :  { %v700_v63 = vpop.f32.mrb[8].mxu1 }
 0x1ec   :  { %v2396_v0 = vpop.f32.mrb[9].mxu1  ;;  %v2658_v14 = vadd.f32 %v3186_v3, %v700_v63  ;;  %v1430_v63 = vld [vmem:[%s3466_s8] sm:$0x3] }
 0x1ed   :  { %v703_v1 = vpop.f32.mrb[10].mxu1 }
 0x1ee   :  { %v2397_v2 = vpop.f32.mrb[11].mxu1  ;;  %v707_v16 = vmax.f32 %v2658_v14, 0.0 }
 0x1f0   :  { %v716_v17 = vpack.c.bf16 %v707_v16, %v707_v16 }
 0x201   :  { %v843_v4 = vpop.f32.mrb[8].mxu0 }
 0x202   :  { %v2659_v5 = vadd.f32 %v3186_v3, %v843_v4  ;;  %v2438_v6 = vpop.f32.mrb[9].mxu0 }
 0x203   :  { %v846_v7 = vpop.f32.mrb[10].mxu0 }
 0x204   :  { %v850_v8 = vmax.f32 %v2659_v5, 0.0  ;;  %v2439_v9 = vpop.f32.mrb[11].mxu0  ;;  %v2748_v7 = vld [vmem:[%s3467_s10] sm:$0xff]  }
 0x205   :  { %v2750_v9 = vld [vmem:[%s3468_s11] sm:$0xff]  }
 0x206   :  { %v860_v11 = vpack.c.bf16 %v850_v8, %v850_v8  ;;  %v2749_v8 = vld [vmem:[%s3467_s10 + $0x8] sm:$0xff]  }
 0x208   :  { %2449 = vmatmul.mubr.msk.bf16.vlgmr.msra.gmra.mrb[12].mxu1 %vm885_vm4, %v860_v11  ;;  %v2153_v11 = vld [vmem:[%s3471_s7] ss:$0 sm:$0xff] }
 0x209   :  { %2453 = vmatpush3.bf16.msra.mxu1 %v2736_v10  ;;  %2460 = vmatprep.mubr.msk.bf16.mxu1 %vm2767_vm2, %v2766_v31 }
 0x20a   :  { %2454 = vmatprep.subr.bf16.mxu1 %v2766_v31 }
 0x20d   :  { %2455 = vmatpush3.bf16.msra.mxu1 %v2737_v12 }
 0x20e   :  { %2456 = vmatprep.subr.bf16.mxu1 %v2766_v31 }
 0x211   :  { %2457 = vmatpush3.bf16.msra.mxu1 %v2738_v13 }
 0x212   :  { %2458 = vmatprep.subr.bf16.mxu1 %v2766_v31 }
 0x215   :  { %2459 = vmatpush3.bf16.msra.mxu1 %v2739_v15 }
 0x216   :  { %2464 = vmatprep.subr.bf16.mxu1 %v2766_v31 }
 0x218   :  { %2461 = vmatmul.mubr.msk.bf16.vlgmr.msra.gmra.mrb[16].mxu1 %vm885_vm4, %v716_v17 }
 0x219   :  { %2465 = vmatpush3.bf16.msra.mxu1 %v2967_v32  ;;  %2474 = vmatprep.mubr.msk.bf16.mxu1 %vm2767_vm2, %v2766_v31 }
 0x21a   :  { %2466 = vmatprep.subr.bf16.mxu1 %v2766_v31 }
 0x21d   :  { %2467 = vmatpush3.bf16.msra.mxu1 %v2981_v37 }
 0x21e   :  { %2468 = vmatprep.subr.bf16.mxu1 %v2766_v31 }
 0x221   :  { %2469 = vmatpush3.bf16.msra.mxu1 %v3001_v42 }
 0x222   :  { %2470 = vmatprep.subr.bf16.mxu1 %v2766_v31 }
 0x225   :  { %2471 = vmatpush3.bf16.msra.mxu1 %v3009_v45 }
 0x226   :  { %2472 = vmatprep.subr.bf16.mxu1 %v2766_v31 }
 0x229   :  { %2473 = vmatpush3.bf16.msra.mxu1 %v3029_v49 }
 0x22a   :  { %2478 = vmatprep.subr.bf16.mxu1 %v2766_v31 }
 0x22c   :  { %2475 = vmatmul.mubr.msk.bf16.vlgmr.msra.gmra.mrb[20].mxu1 %vm429_vm3, %v805_v58 }
 0x22d   :  { %2479 = vmatpush3.bf16.msra.mxu1 %v3051_v52  ;;  %2488 = vmatprep.mubr.msk.bf16.mxu1 %vm2767_vm2, %v2766_v31 }
 0x22e   :  { %2480 = vmatprep.subr.bf16.mxu1 %v2766_v31 }
 0x231   :  { %2481 = vmatpush3.bf16.msra.mxu1 %v3061_v54 }
 0x232   :  { %2482 = vmatprep.subr.bf16.mxu1 %v2766_v31 }
 0x235   :  { %2483 = vmatpush3.bf16.msra.mxu1 %v3068_v55 }
 0x236   :  { %2484 = vmatprep.subr.bf16.mxu1 %v2766_v31 }
 0x239   :  { %2485 = vmatpush3.bf16.msra.mxu1 %v3075_v56 }
 0x23a   :  { %2486 = vmatprep.subr.bf16.mxu1 %v2766_v31 }
 0x23d   :  { %2487 = vmatpush3.bf16.msra.mxu1 %v3082_v57 }
 0x23e   :  { %2492 = vmatprep.subr.bf16.mxu1 %v2766_v31 }
 0x240   :  { %2489 = vmatmul.mubr.msk.bf16.vlgmr.msra.gmra.mrb[20].mxu1 %vm429_vm3, %v1038_v19 }
 0x241   :  { %2493 = vmatpush3.bf16.msra.mxu1 %v3097_v38  ;;  %2502 = vmatprep.mubr.msk.bf16.mxu1 %vm2767_vm2, %v2766_v31 }
 0x242   :  { %2494 = vmatprep.subr.bf16.mxu1 %v2766_v31 }
 0x245   :  { %2495 = vmatpush3.bf16.msra.mxu1 %v3107_v44 }
 0x246   :  { %2496 = vmatprep.subr.bf16.mxu1 %v2766_v31 }
 0x249   :  { %2497 = vmatpush3.bf16.msra.mxu1 %v3121_v46 }
 0x24a   :  { %2498 = vmatprep.subr.bf16.mxu1 %v2766_v31 }
 0x24d   :  { %2499 = vmatpush3.bf16.msra.mxu1 %v3130_v47 }
 0x24e   :  { %2500 = vmatprep.subr.bf16.mxu1 %v2766_v31 }
 0x251   :  { %2501 = vmatpush3.bf16.msra.mxu1 %v3139_v48 }
 0x252   :  { %2560 = vmatprep.subr.bf16.mxu1 %v2766_v31 }
 0x254   :  { %2503 = vmatmul.mubr.msk.bf16.vlgmr.msra.gmra.mrb[20].mxu1 %vm429_vm3, %v1084_v21 }
 0x255   :  { %2568 = vmatprep.mubr.msk.bf16.mxu1 %vm2767_vm2, %v2766_v31 }
 0x2db   :  { %v923_v26 = vpop.f32.mrb[12].mxu1 }
 0x2dc   :  { %v2450_v27 = vpop.f32.mrb[13].mxu1 }
 0x2dd   :  { %v926_v28 = vpop.f32.mrb[14].mxu1 }
 0x2de   :  { %v2451_v29 = vpop.f32.mrb[15].mxu1  ;;  %v2752_v28 = vld [vmem:[%s3470_s17] sm:$0xff]  }
 0x2df   :  { %v2753_v29 = vld [vmem:[%s3470_s17 + $0x8] sm:$0xff]  }
 0x2eb   :  { %v990_v30 = vpop.f32.mrb[16].mxu1 }
 0x2ec   :  { %v3272_v34 = vadd.f32 %v990_v30, %v923_v26  ;;  %v2462_v35 = vpop.f32.mrb[17].mxu1  ;;  %v2751_v26 = vld [vmem:[%s3469_s12] sm:$0xff]  }
 0x2ed   :  { %v993_v39 = vpop.f32.mrb[18].mxu1  ;;  %v2754_v30 = vld [vmem:[%s3473_s14] sm:$0xff]   ;;  %v2756_v35 = vld [vmem:[%s3473_s14 + $0x10] sm:$0xff]  }
 0x2ee   :  { %v2463_v40 = vpop.f32.mrb[19].mxu1 }
 0x327   :  { %v1122_v41 = vpop.f32.mrb[20].mxu1 }
 0x328   :  { %v2660_v43 = vadd.f32 %v3186_v3, %v1122_v41  ;;  %v2504_v50 = vpop.f32.mrb[21].mxu1 }
 0x329   :  { %v1125_v51 = vpop.f32.mrb[22].mxu1 }
 0x32a   :  { %v1129_v53 = vmax.f32 %v2660_v43, 0.0  ;;  %v2505_v58 = vpop.f32.mrb[23].mxu1 }
 0x32c   :  { %v1139_v59 = vpack.c.bf16 %v1129_v53, %v1129_v53 }
 0x32e   :  { %2515 = vmatmul.mubr.msk.bf16.vlgmr.msra.gmra.mrb[12].mxu0 %vm885_vm4, %v1139_v59 }
 0x32f   :  { %2519 = vmatpush3.bf16.msra.mxu0 %v2967_v32  ;;  %2528 = vmatprep.mubr.msk.bf16.mxu0 %vm2767_vm2, %v2766_v31  ;;  %v1249_v32 = vld [vmem:[#allocation2 + $0x38] sm:$0xff] }
 0x330   :  { %2520 = vmatprep.subr.bf16.mxu0 %v2766_v31 }
 0x333   :  { %2521 = vmatpush3.bf16.msra.mxu0 %v2981_v37  ;;  %v1250_v37 = vpack.c.bf16 %v1249_v32, %v1249_v32 }
 0x334   :  { %2522 = vmatprep.subr.bf16.mxu0 %v2766_v31 }
 0x337   :  { %2523 = vmatpush3.bf16.msra.mxu0 %v3001_v42  ;;  %v1295_v42 = vld [vmem:[#allocation2 + $0x40] sm:$0xff] }
 0x338   :  { %2524 = vmatprep.subr.bf16.mxu0 %v2766_v31 }
 0x33b   :  { %2525 = vmatpush3.bf16.msra.mxu0 %v3009_v45  ;;  %v1296_v45 = vpack.c.bf16 %v1295_v42, %v1295_v42 }
 0x33c   :  { %2526 = vmatprep.subr.bf16.mxu0 %v2766_v31 }
 0x33f   :  { %2527 = vmatpush3.bf16.msra.mxu0 %v3029_v49  ;;  %v2744_v49 = vld [vmem:[%s3497_s3 + $0x60] sm:$0xff]  }
 0x340   :  { %2532 = vmatprep.subr.bf16.mxu0 %v2766_v31  ;;  %2561 = vmatpush3.bf16.msra.mxu1 %v2744_v49 }
 0x341   :  { %2562 = vmatprep.subr.bf16.mxu1 %v2766_v31 }
 0x342   :  { %2529 = vmatmul.mubr.msk.bf16.vlgmr.msra.gmra.mrb[16].mxu0 %vm429_vm3, %v1084_v21 }
 0x343   :  { %2533 = vmatpush3.bf16.msra.mxu0 %v3051_v52  ;;  %2542 = vmatprep.mubr.msk.bf16.mxu0 %vm2767_vm2, %v2766_v31  ;;  %v2745_v52 = vld [vmem:[%s3497_s3 + $0x68] sm:$0xff]  }
 0x344   :  { %2534 = vmatprep.subr.bf16.mxu0 %v2766_v31  ;;  %2563 = vmatpush3.bf16.msra.mxu1 %v2745_v52 }
 0x345   :  { %2564 = vmatprep.subr.bf16.mxu1 %v2766_v31 }
 0x347   :  { %2535 = vmatpush3.bf16.msra.mxu0 %v3061_v54  ;;  %v2746_v54 = vld [vmem:[%s3497_s3 + $0x70] sm:$0xff]  }
 0x348   :  { %2536 = vmatprep.subr.bf16.mxu0 %v2766_v31  ;;  %2565 = vmatpush3.bf16.msra.mxu1 %v2746_v54 }
 0x349   :  { %2566 = vmatprep.subr.bf16.mxu1 %v2766_v31 }
 0x34b   :  { %2537 = vmatpush3.bf16.msra.mxu0 %v3068_v55  ;;  %v2747_v55 = vld [vmem:[%s3497_s3 + $0x78] sm:$0xff]  }
 0x34c   :  { %2538 = vmatprep.subr.bf16.mxu0 %v2766_v31  ;;  %2567 = vmatpush3.bf16.msra.mxu1 %v2747_v55 }
 0x34d   :  { %2572 = vmatprep.subr.bf16.mxu1 %v2766_v31 }
 0x34f   :  { %2539 = vmatpush3.bf16.msra.mxu0 %v3075_v56 }
 0x350   :  { %2540 = vmatprep.subr.bf16.mxu0 %v2766_v31 }
 0x353   :  { %2541 = vmatpush3.bf16.msra.mxu0 %v3082_v57 }
 0x354   :  { %2546 = vmatprep.subr.bf16.mxu0 %v2766_v31 }
 0x356   :  { %2543 = vmatmul.mubr.msk.bf16.vlgmr.msra.gmra.mrb[16].mxu0 %vm429_vm3, %v1250_v37  ;;  %v2163_v37 = vld [vmem:[%s3475_s13] ss:$0 sm:$0xff] }
 0x357   :  { %2547 = vmatpush3.bf16.msra.mxu0 %v3097_v38  ;;  %2556 = vmatprep.mubr.msk.bf16.mxu0 %vm2767_vm2, %v2766_v31 }
 0x358   :  { %2548 = vmatprep.subr.bf16.mxu0 %v2766_v31 }
 0x35b   :  { %2549 = vmatpush3.bf16.msra.mxu0 %v3107_v44 }
 0x35c   :  { %2550 = vmatprep.subr.bf16.mxu0 %v2766_v31 }
 0x35f   :  { %2551 = vmatpush3.bf16.msra.mxu0 %v3121_v46 }
 0x360   :  { %2552 = vmatprep.subr.bf16.mxu0 %v2766_v31 }
 0x363   :  { %2553 = vmatpush3.bf16.msra.mxu0 %v3130_v47  ;;  %v2769_v47 = vmov 65535  }
 0x364   :  { %2554 = vmatprep.subr.bf16.mxu0 %v2766_v31 }
 0x367   :  { %2555 = vmatpush3.bf16.msra.mxu0 %v3139_v48  ;;  %v1447_v48 = vsel %vm110_vm0, 4294967295, %v2769_v47 }
 0x368   :  { %2578 = vmatprep.subr.bf16.mxu0 %v2766_v31  ;;  %v1448_v0 = vsel %vm1446_vm5, %v1447_v48, 0  ;;  %v2759_v48 = vld [vmem:[%s3476_s16] sm:$0xff]  }
 0x369   :  { %v1450_v5 = vand.u32 %v1448_v0, %v1430_v63 }
 0x36a   :  { %2557 = vmatmul.mubr.msk.bf16.vlgmr.msra.gmra.mrb[16].mxu0 %vm429_vm3, %v1296_v45 }
 0x36b   :  { %2580 = vmatprep.mubr.msk.bf16.mxu0 %vm2767_vm2, %v2766_v31  ;;  %2579 = vmatpush3.bf16.msra.mxu0 %v2750_v9 }
 0x36c   :  { %2592 = vmatprep.subr.bf16.mxu0 %v2766_v31 }
 0x401   :  { %v1201_v56 = vpop.f32.mrb[12].mxu0 }
 0x402   :  { %v1207_v57 = vadd.f32 %v1201_v56, %v3272_v34  ;;  %v2516_v38 = vpop.f32.mrb[13].mxu0  ;;  %v2755_v34 = vld [vmem:[%s3473_s14 + $0x8] sm:$0xff]   ;;  %v2758_v56 = vld [vmem:[%s3474_s18] sm:$0xff]  }
 0x403   :  { %v1204_v44 = vpop.f32.mrb[14].mxu0 }
 0x404   :  { %v2517_v46 = vpop.f32.mrb[15].mxu0 }
 0x43d   :  { %v1334_v60 = vpop.f32.mrb[16].mxu0 }
 0x43e   :  { %v2661_v61 = vadd.f32 %v3186_v3, %v1334_v60  ;;  %v2558_v62 = vpop.f32.mrb[17].mxu0  ;;  %v1441_v3 = vpop.permute.xlu0 %1440  ;;  %v2164_v60 = vld [vmem:[%s3477_s15] ss:$0 sm:$0xff]  ;;  %s2770_s15 = smov 112  }
 0x43f   :  { %v1337_v1 = vpop.f32.mrb[18].mxu0 }
 0x440   :  { %v1341_v2 = vmax.f32 %v2661_v61, 0.0  ;;  %v2559_v4 = vpop.f32.mrb[19].mxu0 }
 0x442   :  { %v1351_v6 = vpack.c.bf16 %v1341_v2, %v1341_v2 }
 0x444   :  { %2569 = vmatmul.mubr.msk.bf16.vlgmr.msra.gmra.mrb[24].mxu1 %vm885_vm4, %v1351_v6 }
 0x445   :  { %2573 = vmatpush3.bf16.msra.mxu1 %v1450_v5  ;;  %2574 = vmatprep.mubr.msk.bf16.mxu1 %vm2767_vm2, %v2766_v31 }
 0x446   :  { %2584 = vmatprep.subr.bf16.mxu1 %v2766_v31 }
 0x44c   :  { %2575 = vmatmul.mubr.msk.bf16.vlgmr.msra.gmra.mrb[28].mxu1 %vm1442_vm6, %v1441_v3 }
 0x44d   :  { %2588 = vmatprep.mubr.msk.bf16.mxu1 %vm2767_vm2, %v2766_v31  ;;  %2585 = vmatpush3.bf16.msra.mxu1 %v2748_v7 }
 0x44e   :  { %2586 = vmatprep.subr.bf16.mxu1 %v2766_v31 }
 0x451   :  { %2587 = vmatpush3.bf16.msra.mxu1 %v2749_v8 }
 0x452   :  { %2598 = vmatprep.subr.bf16.mxu1 %v2766_v31 }
 0x517   :  { %v1413_v10 = vpop.f32.mrb[24].mxu1 }
 0x518   :  { %v1419_v12 = vadd.f32 %v1413_v10, %v1207_v57  ;;  %v2570_v13 = vpop.f32.mrb[25].mxu1 }
 0x519   :  { %v1416_v14 = vpop.f32.mrb[26].mxu1 }
 0x51a   :  { %v1427_v15 = vadd.f32 %v2153_v11, %v1419_v12  ;;  %v2571_v16 = vpop.f32.mrb[27].mxu1  ;;  %v2760_v12 = vld [vmem:[%s3479_s20] sm:$0xff]   ;;  %v2762_v14 = vld [vmem:[%s3479_s20 + $0x10] sm:$0xff]  }
 0x51c   :  { %v1428_v17 = vmax.f32 %v1427_v15, 0.0  ;;  %v2763_v15 = vld [vmem:[%s3479_s20 + $0x18] sm:$0xff]  }
 0x51e   :  { %v1497_v19 = vpack.c.bf16 %v1428_v17, %v1428_v17 }
 0x51f   :  { %v1486_v20 = vpop.f32.mrb[28].mxu1 }
 0x520   :  { %v1487_v21 = vadd.f32 %v2154_v18, %v1486_v20  ;;  %v2576_v22 = vpop.f32.mrb[29].mxu1  ;;  %2589 = vmatmul.mubr.msk.bf16.vlgmr.msra.gmra.mrb[32].mxu1 %vm1563_vm7, %v1497_v19 }
 0x521   :  { %v1489_v23 = vpop.f32.mrb[30].mxu1  ;;  %2606 = vmatprep.mubr.msk.bf16.mxu1 %vm2767_vm2, %v2766_v31  ;;  %2599 = vmatpush3.bf16.msra.mxu1 %v2754_v30 }
 0x522   :  { %v1492_v24 = vmax.f32 %v1487_v21, 0.0  ;;  %v2577_v25 = vpop.f32.mrb[31].mxu1  ;;  %2600 = vmatprep.subr.bf16.mxu1 %v2766_v31 }
 0x524   :  { %v1500_v27 = vpack.c.bf16 %v1492_v24, %v1492_v24 }
 0x525   :  { %2601 = vmatpush3.bf16.msra.mxu1 %v2755_v34 }
 0x526   :  { %2581 = vmatmul.mubr.msk.bf16.vlgmr.msra.gmra.mrb[20].mxu0 %vm1507_vm8, %v1500_v27  ;;  %2602 = vmatprep.subr.bf16.mxu1 %v2766_v31 }
 0x527   :  { %2593 = vmatpush3.bf16.msra.mxu0 %v2751_v26  ;;  %2594 = vmatprep.mubr.msk.bf16.mxu0 %vm2767_vm2, %v2766_v31 }
 0x528   :  { %2610 = vmatprep.subr.bf16.mxu0 %v2766_v31 }
 0x529   :  { %2603 = vmatpush3.bf16.msra.mxu1 %v2756_v35 }
 0x52a   :  { %2604 = vmatprep.subr.bf16.mxu1 %v2766_v31 }
 0x52e   :  { %2595 = vmatmul.mubr.msk.bf16.vlgmr.msra.gmra.mrb[24].mxu0 %vm1507_vm8, %v3276_v36  ;;  %v2757_v36 = vld [vmem:[%s3473_s14 + $0x18] sm:$0xff]  }
 0x52f   :  { %2611 = vmatpush3.bf16.msra.mxu0 %v2752_v28  ;;  %2614 = vmatprep.mubr.msk.bf16.mxu0 %vm2767_vm2, %v2766_v31 }
 0x530   :  { %2612 = vmatprep.subr.bf16.mxu0 %v2766_v31  ;;  %2605 = vmatpush3.bf16.msra.mxu1 %v2757_v36 }
 0x531   :  { %2624 = vmatprep.subr.bf16.mxu1 %v2766_v31 }
 0x533   :  { %2613 = vmatpush3.bf16.msra.mxu0 %v2753_v29 }
 0x534   :  { %2618 = vmatprep.subr.bf16.mxu0 %v2766_v31 }
 0x536   :  { %2615 = vmatmul.mubr.msk.bf16.vlgmr.msra.gmra.mrb[28].mxu0 %vm1563_vm7, %v1497_v19  ;;  %v2177_v19 = vld [vmem:[%s3480_s19] ss:$0 sm:$0xff] }
 0x537   :  { %2620 = vmatprep.mubr.msk.bf16.mxu0 %vm2767_vm2, %v2766_v31  ;;  %2619 = vmatpush3.bf16.msra.mxu0 %v2759_v48 }
 0x538   :  { %2630 = vmatprep.subr.bf16.mxu0 %v2766_v31 }
 0x5f3   :  { %v1601_v39 = vpop.f32.mrb[32].mxu1 }
 0x5f4   :  { %v2590_v40 = vpop.f32.mrb[33].mxu1 }
 0x5f5   :  { %v1604_v41 = vpop.f32.mrb[34].mxu1 }
 0x5f6   :  { %v2591_v43 = vpop.f32.mrb[35].mxu1 }
 0x5f9   :  { %v1545_v50 = vpop.f32.mrb[20].mxu0 }
 0x5fa   :  { %v1602_v51 = vadd.f32 %v1601_v39, %v1545_v50  ;;  %v2582_v53 = vpop.f32.mrb[21].mxu0 }
 0x5fb   :  { %v1548_v58 = vpop.f32.mrb[22].mxu0 }
 0x5fc   :  { %v2583_v59 = vpop.f32.mrb[23].mxu0 }
 0x601   :  { %v1652_v32 = vpop.f32.mrb[24].mxu0 }
 0x602   :  { %v1658_v42 = vadd.f32 %v1652_v32, %v1602_v51  ;;  %v2596_v45 = vpop.f32.mrb[25].mxu0 }
 0x603   :  { %v1655_v49 = vpop.f32.mrb[26].mxu0 }
 0x604   :  { %v1666_v52 = vadd.f32 %v2163_v37, %v1658_v42  ;;  %v2597_v54 = vpop.f32.mrb[27].mxu0 }
 0x606   :  { %v1667_v55 = vmax.f32 %v1666_v52, 0.0 }
 0x608   :  { %v1676_v57 = vpack.c.bf16 %v1667_v55, %v1667_v55 }
 0x609   :  { %v1813_v38 = vpop.f32.mrb[28].mxu0 }
 0x60a   :  { %2607 = vmatmul.mubr.msk.bf16.vlgmr.msra.gmra.mrb[36].mxu1 %vm885_vm4, %v1676_v57  ;;  %v2616_v44 = vpop.f32.mrb[29].mxu0 }
 0x60b   :  { %v1816_v46 = vpop.f32.mrb[30].mxu0  ;;  %2625 = vmatpush3.bf16.msra.mxu1 %v2758_v56  ;;  %2626 = vmatprep.mubr.msk.bf16.mxu1 %vm2767_vm2, %v2766_v31 }
 0x60c   :  { %v2617_v47 = vpop.f32.mrb[31].mxu0 }
 0x612   :  { %2627 = vmatmul.mubr.msk.bf16.vlgmr.msra.gmra.mrb[40].mxu1 %vm1507_vm8, %v1500_v27 }
 0x6dd   :  { %v1745_v61 = vpop.f32.mrb[36].mxu1 }
 0x6de   :  { %v1746_v62 = vadd.f32 %v2164_v60, %v1745_v61  ;;  %v2608_v63 = vpop.f32.mrb[37].mxu1 }
 0x6df   :  { %v1748_v0 = vpop.f32.mrb[38].mxu1 }
 0x6e0   :  { %v1751_v1 = vmul.f32 0.5, %v1746_v62  ;;  %2009 = vst.msk [vmem:[%s3478_s22] sm:$0xff] %vm1563_vm7, %v1746_v62  ;;  %v2609_v2 = vpop.f32.mrb[39].mxu1 }
 0x6e2   :  { %v1752_v4 = vmul.f32 1.442695, %v1751_v1 }
 0x6e4   :  { %2764 = vpow2.f32 %v1752_v4 }
 0x6e5   :  { %v1910_v5 = vpop.f32.mrb[40].mxu1 }
 0x6e6   :  { %v2628_v6 = vpop.f32.mrb[41].mxu1 }
 0x6e7   :  { %v1913_v3 = vpop.f32.mrb[42].mxu1 }
 0x6e8   :  { %v2629_v7 = vpop.f32.mrb[43].mxu1 }
 0x6ee   :  { %v2765_v8 = vpop.eup %2764 }
 0x6ef   :  { %v1754_v9 = vmul.f32 %v2765_v8, %v3270_v33  ;;  %v2761_v33 = vld [vmem:[%s3479_s20 + $0x8] sm:$0xff]   ;;  %s2771_s20 = smov 32  }
 0x6f1   :  { %1756 = vrot.lane.b32.xlu0 %v1754_v9, %s2770_s15 }
 0x763   :  { %v1757_v10 = vpop.permute.xlu0 %1756 }
 0x764   :  { %v1759_v11 = vadd.f32 %v1757_v10, %v1746_v62 }
 0x766   :  { %v1762_v13 = vpack.c.bf16 %v1759_v11, %v1759_v11 }
 0x768   :  { %2621 = vmatmul.mubr.msk.bf16.vlgmr.msra.gmra.mrb[32].mxu0 %vm1507_vm8, %v1762_v13 }
 0x769   :  { %2631 = vmatpush3.bf16.msra.mxu0 %v2760_v12  ;;  %2638 = vmatprep.mubr.msk.bf16.mxu0 %vm2767_vm2, %v2766_v31 }
 0x76a   :  { %2632 = vmatprep.subr.bf16.mxu0 %v2766_v31 }
 0x76d   :  { %2633 = vmatpush3.bf16.msra.mxu0 %v2761_v33 }
 0x76e   :  { %2634 = vmatprep.subr.bf16.mxu0 %v2766_v31 }
 0x771   :  { %2635 = vmatpush3.bf16.msra.mxu0 %v2762_v14 }
 0x772   :  { %2636 = vmatprep.subr.bf16.mxu0 %v2766_v31  ;;  %v2178_v31 = vld [vmem:[%s3481_s21] ss:$0 sm:$0xff] }
 0x775   :  { %2637 = vmatpush3.bf16.msra.mxu0 %v2763_v15 }
 0x83b   :  { %v1862_v16 = vpop.f32.mrb[32].mxu0 }
 0x83c   :  { %v1863_v17 = vadd.f32 %v1862_v16, %v1813_v38  ;;  %v2622_v18 = vpop.f32.mrb[33].mxu0 }
 0x83d   :  { %v1865_v20 = vpop.f32.mrb[34].mxu0 }
 0x83e   :  { %v1916_v21 = vadd.f32 %v1910_v5, %v1863_v17  ;;  %v2623_v22 = vpop.f32.mrb[35].mxu0 }
 0x840   :  { %v1924_v23 = vadd.f32 %v2177_v19, %v1916_v21 }
 0x842   :  { %v1925_v24 = vmax.f32 %v1924_v23, 0.0 }
 0x844   :  { %v1934_v25 = vpack.c.bf16 %v1925_v24, %v1925_v24 }
 0x846   :  { %2639 = vmatmul.mubr.msk.bf16.vlgmr.msra.gmra.mrb[36].mxu0 %vm885_vm4, %v1934_v25 }
 0x919   :  { %v2003_v26 = vpop.f32.mrb[36].mxu0 }
 0x91a   :  { %v2004_v27 = vadd.f32 %v2178_v31, %v2003_v26  ;;  %v2640_v28 = vpop.f32.mrb[37].mxu0 }
 0x91b   :  { %v2006_v29 = vpop.f32.mrb[38].mxu0 }
 0x91c   :  { %2011 = vrot.lane.b32.xlu1 %v2004_v27, %s2771_s20  ;;  %v2641_v30 = vpop.f32.mrb[39].mxu0 }
 0x98e   :  { %v2012_v34 = vpop.permute.xlu1 %2011 }
 0x98f   :  { %2015 = vst.msk [vmem:[%s3478_s22] sm:$0xff] %vm2014_vm9, %v2012_v34 }

</bundles_post_ra>
